<compile_context>
chip_gen: v7x
topology: tpu7x:2x2x1
jax: 0.10.0
libtpu: 0.0.40
codegen_flags: <defaults>
</compile_context>

<pallas_src>
import functools
import math

import numpy as np
import jax
import jax.numpy as jnp
from jax.experimental import pallas as pl
from jax.experimental.pallas import tpu as pltpu


_LANE = 128  # TPU vreg lane width; pad lane-adjacent dims to multiples of this.


def _round_up(x, m):
    return (x + m - 1) // m * m


# ---------------- resampling weight construction (trace-time glue, numpy) ----

def _sinc(x):
    return np.where(x != 0, np.sin(np.pi * x) / (np.pi * x), 1.0)


def _lanczos(x, a):
    cond = np.logical_and(-a < x, x < a)
    out = np.where(cond, _sinc(x) * _sinc(x / a), 0.0)
    return out / out.sum()


def _ramp(ratio, width):
    n = math.ceil(width / ratio + 1)
    out = np.arange(n, dtype=np.float64) * ratio
    return np.concatenate([-out[1:][::-1], out])[1:-1]


def _antialias_matrix(s, out_size):
    """R (s, s) reproducing F.pad(reflect) + F.conv2d with the lanczos kernel."""
    if out_size >= s:
        return np.eye(s, dtype=np.float64)
    k = _lanczos(_ramp(out_size / s, 2), 2)
    kh = k.shape[0]
    pad = (kh - 1) // 2
    i = np.arange(s)[:, None]                       # (s, 1) output row
    q = i + np.arange(kh)[None, :] - pad            # (s, kh) source index
    q = np.abs(q)                                   # reflect at 0
    q = np.where(q > s - 1, 2 * (s - 1) - q, q)     # reflect at s-1
    R = np.zeros((s, s), dtype=np.float64)
    np.add.at(R, (np.broadcast_to(i, q.shape), q),
              np.broadcast_to(k[None, :], q.shape))
    return R


def _bicubic_matrix(s, out_size):
    """M (out_size, s): PyTorch bicubic (a=-0.75), align_corners=True, clamped."""
    A = -0.75

    def cc1(t):  # |t| <= 1
        return ((A + 2) * t - (A + 3)) * t * t + 1

    def cc2(t):  # 1 < |t| < 2
        return ((A * t - 5 * A) * t + 8 * A) * t - 4 * A

    scale = (s - 1) / (out_size - 1) if out_size > 1 else 0.0
    x = np.arange(out_size, dtype=np.float64) * scale
    x0 = np.floor(x).astype(np.int64)
    t = x - x0
    coeffs = np.stack([cc2(t + 1.0), cc1(t), cc1(1.0 - t), cc2(2.0 - t)], axis=1)
    idx = np.clip(x0[:, None] + np.arange(-1, 3)[None, :], 0, s - 1)
    M = np.zeros((out_size, s), dtype=np.float64)
    rows = np.broadcast_to(np.arange(out_size)[:, None], idx.shape)
    np.add.at(M, (rows, idx), coeffs)
    return M


@functools.lru_cache(maxsize=None)
def _resample_matrix(size, cut_size):
    """(cut_size, size): bicubic(align_corners=True) @ lanczos antialias."""
    return _bicubic_matrix(size, cut_size) @ _antialias_matrix(size, cut_size)


# ---------------- Pallas kernel (hot path) ----------------

def _cutout_kernel(a_ref, x_ref, b_ref, o_ref):
    # a_ref: (1, cs_p, H_p)      cutout-i row operator (crop-in-Y + resample)
    # x_ref: (NC, H_p, W_p)      image slabs, VMEM-resident (constant index_map)
    # b_ref: (1, W_p, cs_p)      cutout-i column operator (crop-in-X + resample)
    # o_ref: (1, NC, cs_p, cs_p) lane-dense output slab for this cutout
    a = a_ref[0]
    b = b_ref[0]
    for c in range(x_ref.shape[0]):                 # static unroll over channels
        y = jnp.dot(a, x_ref[c], preferred_element_type=jnp.float32)        # (cs_p, W_p)
        out = jnp.dot(y.astype(b.dtype), b, preferred_element_type=jnp.float32)  # (cs_p, cs_p)
        # ClampWithGrad forward == clamp.
        # TODO(synk): add jax.custom_vjp for the straight-through backward if
        # this path is ever differentiated (only forward is implemented here).
        o_ref[0, c] = jnp.clip(out, 0.0, 1.0).astype(o_ref.dtype)


@functools.partial(jax.jit, static_argnames=("cut_size",))
def make_cutouts_pallas(x_nchw, a_all, b_all, *, cut_size):
    N, C, H, W = x_nchw.shape
    NC = N * C
    cutn, cs_p, H_p = a_all.shape
    W_p = b_all.shape[1]

    # bf16 (a_all.dtype) at the kernel boundary; zero-pad to 128-aligned dims.
    x_flat = x_nchw.reshape(NC, H, W).astype(a_all.dtype)
    if (H_p, W_p) != (H, W):
        x_flat = jnp.pad(x_flat, ((0, 0), (0, H_p - H), (0, W_p - W)))

    out = pl.pallas_call(
        _cutout_kernel,
        out_shape=jax.ShapeDtypeStruct((cutn, NC, cs_p, cs_p), x_nchw.dtype),
        grid_spec=pltpu.PrefetchScalarGridSpec(
            num_scalar_prefetch=0,
            grid=(cutn,),                                       # one fat step per cutout
            in_specs=[
                pl.BlockSpec((1, cs_p, H_p), lambda i: (i, 0, 0)),   # stream A_i
                pl.BlockSpec((NC, H_p, W_p), lambda i: (0, 0, 0)),   # image: fetched once, resident
                pl.BlockSpec((1, W_p, cs_p), lambda i: (i, 0, 0)),   # stream B_i
            ],
            out_specs=pl.BlockSpec((1, NC, cs_p, cs_p),
                                   lambda i: (i, 0, 0, 0)),
        ),
        compiler_params=pltpu.CompilerParams(
            # independent per-cutout steps -> megacore can shard this axis on
            # v7x (keep cutn even / >= 2 there for balanced cores).
            dimension_semantics=("parallel",),
            # Footprint is a few MB even at 512^2/cutn=32; raise
            # vmem_limit_bytes here only if NC*H*W grows substantially.
        ),
    )(a_all, x_flat, b_all)

    # crop the 128-lane padding, then torch.cat(cutouts, dim=0) layout.
    out = out[:, :, :cut_size, :cut_size]
    return out.reshape(cutn * N, C, cut_size, cut_size)


# ---------------- module wrapper ----------------

class MakeCutouts:
    """Forward-pass equivalent of the PyTorch MakeCutouts module."""

    def __init__(self, cut_size, cutn, cut_pow=1.0, compute_dtype=jnp.bfloat16):
        self.cut_size = cut_size
        self.cutn = cutn
        self.cut_pow = cut_pow
        self.compute_dtype = compute_dtype

    def __call__(self, x, key):
        N, C, H, W = x.shape
        sideY, sideX = H, W
        max_size = min(sideX, sideY)
        min_size = min(sideX, sideY, self.cut_size)

        # Random size/offset sampling: one batched draw, ONE host sync
        # (replaces 3*cutn blocking device->host pulls).
        k1, k2, k3 = jax.random.split(key, 3)
        rand = np.asarray(jnp.stack([
            jax.random.uniform(k1, (self.cutn,)),
            jax.random.uniform(k2, (self.cutn,)),
            jax.random.uniform(k3, (self.cutn,)),
        ]))
        sizes = (rand[0] ** self.cut_pow * (max_size - min_size)
                 + min_size).astype(np.int64)
        oxs = np.minimum((rand[1] * (sideX - sizes + 1)).astype(np.int64),
                         sideX - sizes)
        oys = np.minimum((rand[2] * (sideY - sizes + 1)).astype(np.int64),
                         sideY - sizes)

        # Fold crop + lanczos antialias + bicubic resize into A_i / B_i,
        # zero-embedded into 128-aligned (lane-dense, MXU-aligned) shapes.
        cs_p = _round_up(self.cut_size, _LANE)
        H_p = _round_up(H, _LANE)
        W_p = _round_up(W, _LANE)
        a_np = np.zeros((self.cutn, cs_p, H_p), dtype=np.float32)
        b_np = np.zeros((self.cutn, W_p, cs_p), dtype=np.float32)
        for i in range(self.cutn):
            size, ox, oy = int(sizes[i]), int(oxs[i]), int(oys[i])
            mr = _resample_matrix(size, self.cut_size)        # (cut_size, size)
            a_np[i, :self.cut_size, oy:oy + size] = mr        # crop-in-Y + resample rows
            b_np[i, ox:ox + size, :self.cut_size] = mr.T      # crop-in-X + resample cols

        a_all = jnp.asarray(a_np, dtype=self.compute_dtype)
        b_all = jnp.asarray(b_np, dtype=self.compute_dtype)
        out = make_cutouts_pallas(x, a_all, b_all, cut_size=self.cut_size)
        return out, (a_all, b_all)


# ---------------- demo ----------------

if __name__ == "__main__":
    N, C, H, W = 2, 4, 16, 16
    cut_size, cutn, cut_pow = 8, 4, 1.0

    root = jax.random.PRNGKey(0)
    k_img, k_cuts = jax.random.split(root)
    # values slightly outside [0, 1] so the clamp path is exercised
    x = jax.random.uniform(k_img, (N, C, H, W), dtype=jnp.float32,
                           minval=-0.25, maxval=1.25)

    mc = MakeCutouts(cut_size, cutn, cut_pow)
    out, (a_all, b_all) = mc(x, k_cuts)
    out = jax.block_until_ready(out)
    assert out.shape == (cutn * N, C, cut_size, cut_size)
    assert out.dtype == x.dtype

    # pure-JAX reference mirroring the kernel numerics (bf16 inputs, f32 accum)
    NC = N * C
    cs_p, H_p = a_all.shape[1], a_all.shape[2]
    W_p = b_all.shape[1]
    x_p = jnp.pad(x.reshape(NC, H, W).astype(a_all.dtype),
                  ((0, 0), (0, H_p - H), (0, W_p - W)))
    y = jnp.einsum("ksh,chw->kcsw", a_all, x_p,
                   preferred_element_type=jnp.float32)
    ref = jnp.einsum("kcsw,kwt->kcst", y.astype(b_all.dtype), b_all,
                     preferred_element_type=jnp.float32)
    ref = jnp.clip(ref, 0.0, 1.0)[:, :, :cut_size, :cut_size]
    ref = ref.reshape(cutn * N, C, cut_size, cut_size).astype(x.dtype)
    err = float(jnp.max(jnp.abs(out - ref)))
    assert err < 5e-3, f"mismatch vs reference: max abs err {err}"

    print("KERNEL_OK")
</pallas_src>

<mosaic_0001>
module attributes {stable_mosaic.version = 11 : i64} {
  func.func @_cutout_kernel(%arg0: i32, %arg1: memref<1x128x128xbf16, #tpu.memory_space<vmem>>, %arg2: memref<8x128x128xbf16, #tpu.memory_space<vmem>>, %arg3: memref<1x128x128xbf16, #tpu.memory_space<vmem>>, %arg4: memref<1x8x128x128xf32, #tpu.memory_space<vmem>>) attributes {dimension_semantics = [#tpu.dimension_semantics<parallel>], iteration_bounds = array<i64: 4>, scalar_prefetch = 0 : i64, scratch_operands = 0 : i64, tpu.core_type = #tpu.core_type<tc>, window_params = [{transform_indices = @transform_0, window_bounds = array<i64: 1, 128, 128>}, {pipeline_mode = #tpu.pipeline_mode<synchronous>, transform_indices = @transform_1, window_bounds = array<i64: 8, 128, 128>}, {transform_indices = @transform_2, window_bounds = array<i64: 1, 128, 128>}, {transform_indices = @transform_3, window_bounds = array<i64: 1, 8, 128, 128>}]} {
    %c0 = arith.constant 0 : index
    %c0_0 = arith.constant 0 : index
    %c0_1 = arith.constant 0 : index
    %0 = vector.load %arg1[%c0, %c0_0, %c0_1] : memref<1x128x128xbf16, #tpu.memory_space<vmem>>, vector<1x128x128xbf16>
    %1 = vector.shape_cast %0 : vector<1x128x128xbf16> to vector<128x128xbf16>
    %c0_2 = arith.constant 0 : index
    %c0_3 = arith.constant 0 : index
    %c0_4 = arith.constant 0 : index
    %2 = vector.load %arg3[%c0_2, %c0_3, %c0_4] : memref<1x128x128xbf16, #tpu.memory_space<vmem>>, vector<1x128x128xbf16>
    %3 = vector.shape_cast %2 : vector<1x128x128xbf16> to vector<128x128xbf16>
    %c0_5 = arith.constant 0 : index
    %c0_6 = arith.constant 0 : index
    %c0_7 = arith.constant 0 : index
    %4 = vector.load %arg2[%c0_5, %c0_6, %c0_7] : memref<8x128x128xbf16, #tpu.memory_space<vmem>>, vector<1x128x128xbf16>
    %5 = vector.shape_cast %4 : vector<1x128x128xbf16> to vector<128x128xbf16>
    %cst = arith.constant dense<0.000000e+00> : vector<128x128xf32>
    %6 = tpu.matmul %1, %5, %cst {dimension_numbers = #tpu.dot_dimension_numbers<[1], [0], [0], [1], [0, 0, 1, 1], [], []>} : vector<128x128xbf16>, vector<128x128xbf16>, vector<128x128xf32> -> vector<128x128xf32>
    %7 = arith.truncf %6 : vector<128x128xf32> to vector<128x128xbf16>
    %cst_8 = arith.constant dense<0.000000e+00> : vector<128x128xf32>
    %8 = tpu.matmul %7, %3, %cst_8 {dimension_numbers = #tpu.dot_dimension_numbers<[1], [0], [0], [1], [0, 0, 1, 1], [], []>} : vector<128x128xbf16>, vector<128x128xbf16>, vector<128x128xf32> -> vector<128x128xf32>
    %cst_9 = arith.constant 0.000000e+00 : f32
    %cst_10 = arith.constant 1.000000e+00 : f32
    %9 = vector.broadcast %cst_9 : f32 to vector<128x128xf32>
    %10 = arith.maximumf %9, %8 : vector<128x128xf32>
    %11 = vector.broadcast %cst_10 : f32 to vector<128x128xf32>
    %12 = arith.minimumf %11, %10 : vector<128x128xf32>
    %c0_11 = arith.constant 0 : index
    %c0_12 = arith.constant 0 : index
    %c0_13 = arith.constant 0 : index
    %c0_14 = arith.constant 0 : index
    %13 = vector.load %arg4[%c0_11, %c0_12, %c0_13, %c0_14] : memref<1x8x128x128xf32, #tpu.memory_space<vmem>>, vector<1x1x128x128xf32>
    %14 = vector.shape_cast %13 : vector<1x1x128x128xf32> to vector<128x128xf32>
    %15 = vector.shape_cast %12 : vector<128x128xf32> to vector<1x1x128x128xf32>
    tpu.vector_store %arg4[%c0_11, %c0_12, %c0_13, %c0_14], %15 {strides = array<i32>} : memref<1x8x128x128xf32, #tpu.memory_space<vmem>>, vector<1x1x128x128xf32>,
    %c1 = arith.constant 1 : index
    %c0_15 = arith.constant 0 : index
    %c0_16 = arith.constant 0 : index
    %16 = vector.load %arg2[%c1, %c0_15, %c0_16] : memref<8x128x128xbf16, #tpu.memory_space<vmem>>, vector<1x128x128xbf16>
    %17 = vector.shape_cast %16 : vector<1x128x128xbf16> to vector<128x128xbf16>
    %cst_17 = arith.constant dense<0.000000e+00> : vector<128x128xf32>
    %18 = tpu.matmul %1, %17, %cst_17 {dimension_numbers = #tpu.dot_dimension_numbers<[1], [0], [0], [1], [0, 0, 1, 1], [], []>} : vector<128x128xbf16>, vector<128x128xbf16>, vector<128x128xf32> -> vector<128x128xf32>
    %19 = arith.truncf %18 : vector<128x128xf32> to vector<128x128xbf16>
    %cst_18 = arith.constant dense<0.000000e+00> : vector<128x128xf32>
    %20 = tpu.matmul %19, %3, %cst_18 {dimension_numbers = #tpu.dot_dimension_numbers<[1], [0], [0], [1], [0, 0, 1, 1], [], []>} : vector<128x128xbf16>, vector<128x128xbf16>, vector<128x128xf32> -> vector<128x128xf32>
    %cst_19 = arith.constant 0.000000e+00 : f32
    %cst_20 = arith.constant 1.000000e+00 : f32
    %21 = vector.broadcast %cst_19 : f32 to vector<128x128xf32>
    %22 = arith.maximumf %21, %20 : vector<128x128xf32>
    %23 = vector.broadcast %cst_20 : f32 to vector<128x128xf32>
    %24 = arith.minimumf %23, %22 : vector<128x128xf32>
    %c0_21 = arith.constant 0 : index
    %c1_22 = arith.constant 1 : index
    %c0_23 = arith.constant 0 : index
    %c0_24 = arith.constant 0 : index
    %25 = vector.load %arg4[%c0_21, %c1_22, %c0_23, %c0_24] : memref<1x8x128x128xf32, #tpu.memory_space<vmem>>, vector<1x1x128x128xf32>
    %26 = vector.shape_cast %25 : vector<1x1x128x128xf32> to vector<128x128xf32>
    %27 = vector.shape_cast %24 : vector<128x128xf32> to vector<1x1x128x128xf32>
    tpu.vector_store %arg4[%c0_21, %c1_22, %c0_23, %c0_24], %27 {strides = array<i32>} : memref<1x8x128x128xf32, #tpu.memory_space<vmem>>, vector<1x1x128x128xf32>,
    %c2 = arith.constant 2 : index
    %c0_25 = arith.constant 0 : index
    %c0_26 = arith.constant 0 : index
    %28 = vector.load %arg2[%c2, %c0_25, %c0_26] : memref<8x128x128xbf16, #tpu.memory_space<vmem>>, vector<1x128x128xbf16>
    %29 = vector.shape_cast %28 : vector<1x128x128xbf16> to vector<128x128xbf16>
    %cst_27 = arith.constant dense<0.000000e+00> : vector<128x128xf32>
    %30 = tpu.matmul %1, %29, %cst_27 {dimension_numbers = #tpu.dot_dimension_numbers<[1], [0], [0], [1], [0, 0, 1, 1], [], []>} : vector<128x128xbf16>, vector<128x128xbf16>, vector<128x128xf32> -> vector<128x128xf32>
    %31 = arith.truncf %30 : vector<128x128xf32> to vector<128x128xbf16>
    %cst_28 = arith.constant dense<0.000000e+00> : vector<128x128xf32>
    %32 = tpu.matmul %31, %3, %cst_28 {dimension_numbers = #tpu.dot_dimension_numbers<[1], [0], [0], [1], [0, 0, 1, 1], [], []>} : vector<128x128xbf16>, vector<128x128xbf16>, vector<128x128xf32> -> vector<128x128xf32>
    %cst_29 = arith.constant 0.000000e+00 : f32
    %cst_30 = arith.constant 1.000000e+00 : f32
    %33 = vector.broadcast %cst_29 : f32 to vector<128x128xf32>
    %34 = arith.maximumf %33, %32 : vector<128x128xf32>
    %35 = vector.broadcast %cst_30 : f32 to vector<128x128xf32>
    %36 = arith.minimumf %35, %34 : vector<128x128xf32>
    %c0_31 = arith.constant 0 : index
    %c2_32 = arith.constant 2 : index
    %c0_33 = arith.constant 0 : index
    %c0_34 = arith.constant 0 : index
    %37 = vector.load %arg4[%c0_31, %c2_32, %c0_33, %c0_34] : memref<1x8x128x128xf32, #tpu.memory_space<vmem>>, vector<1x1x128x128xf32>
    %38 = vector.shape_cast %37 : vector<1x1x128x128xf32> to vector<128x128xf32>
    %39 = vector.shape_cast %36 : vector<128x128xf32> to vector<1x1x128x128xf32>
    tpu.vector_store %arg4[%c0_31, %c2_32, %c0_33, %c0_34], %39 {strides = array<i32>} : memref<1x8x128x128xf32, #tpu.memory_space<vmem>>, vector<1x1x128x128xf32>,
    %c3 = arith.constant 3 : index
    %c0_35 = arith.constant 0 : index
    %c0_36 = arith.constant 0 : index
    %40 = vector.load %arg2[%c3, %c0_35, %c0_36] : memref<8x128x128xbf16, #tpu.memory_space<vmem>>, vector<1x128x128xbf16>
    %41 = vector.shape_cast %40 : vector<1x128x128xbf16> to vector<128x128xbf16>
    %cst_37 = arith.constant dense<0.000000e+00> : vector<128x128xf32>
    %42 = tpu.matmul %1, %41, %cst_37 {dimension_numbers = #tpu.dot_dimension_numbers<[1], [0], [0], [1], [0, 0, 1, 1], [], []>} : vector<128x128xbf16>, vector<128x128xbf16>, vector<128x128xf32> -> vector<128x128xf32>
    %43 = arith.truncf %42 : vector<128x128xf32> to vector<128x128xbf16>
    %cst_38 = arith.constant dense<0.000000e+00> : vector<128x128xf32>
    %44 = tpu.matmul %43, %3, %cst_38 {dimension_numbers = #tpu.dot_dimension_numbers<[1], [0], [0], [1], [0, 0, 1, 1], [], []>} : vector<128x128xbf16>, vector<128x128xbf16>, vector<128x128xf32> -> vector<128x128xf32>
    %cst_39 = arith.constant 0.000000e+00 : f32
    %cst_40 = arith.constant 1.000000e+00 : f32
    %45 = vector.broadcast %cst_39 : f32 to vector<128x128xf32>
    %46 = arith.maximumf %45, %44 : vector<128x128xf32>
    %47 = vector.broadcast %cst_40 : f32 to vector<128x128xf32>
    %48 = arith.minimumf %47, %46 : vector<128x128xf32>
    %c0_41 = arith.constant 0 : index
    %c3_42 = arith.constant 3 : index
    %c0_43 = arith.constant 0 : index
    %c0_44 = arith.constant 0 : index
    %49 = vector.load %arg4[%c0_41, %c3_42, %c0_43, %c0_44] : memref<1x8x128x128xf32, #tpu.memory_space<vmem>>, vector<1x1x128x128xf32>
    %50 = vector.shape_cast %49 : vector<1x1x128x128xf32> to vector<128x128xf32>
    %51 = vector.shape_cast %48 : vector<128x128xf32> to vector<1x1x128x128xf32>
    tpu.vector_store %arg4[%c0_41, %c3_42, %c0_43, %c0_44], %51 {strides = array<i32>} : memref<1x8x128x128xf32, #tpu.memory_space<vmem>>, vector<1x1x128x128xf32>,
    %c4 = arith.constant 4 : index
    %c0_45 = arith.constant 0 : index
    %c0_46 = arith.constant 0 : index
    %52 = vector.load %arg2[%c4, %c0_45, %c0_46] : memref<8x128x128xbf16, #tpu.memory_space<vmem>>, vector<1x128x128xbf16>
    %53 = vector.shape_cast %52 : vector<1x128x128xbf16> to vector<128x128xbf16>
    %cst_47 = arith.constant dense<0.000000e+00> : vector<128x128xf32>
    %54 = tpu.matmul %1, %53, %cst_47 {dimension_numbers = #tpu.dot_dimension_numbers<[1], [0], [0], [1], [0, 0, 1, 1], [], []>} : vector<128x128xbf16>, vector<128x128xbf16>, vector<128x128xf32> -> vector<128x128xf32>
    %55 = arith.truncf %54 : vector<128x128xf32> to vector<128x128xbf16>
    %cst_48 = arith.constant dense<0.000000e+00> : vector<128x128xf32>
    %56 = tpu.matmul %55, %3, %cst_48 {dimension_numbers = #tpu.dot_dimension_numbers<[1], [0], [0], [1], [0, 0, 1, 1], [], []>} : vector<128x128xbf16>, vector<128x128xbf16>, vector<128x128xf32> -> vector<128x128xf32>
    %cst_49 = arith.constant 0.000000e+00 : f32
    %cst_50 = arith.constant 1.000000e+00 : f32
    %57 = vector.broadcast %cst_49 : f32 to vector<128x128xf32>
    %58 = arith.maximumf %57, %56 : vector<128x128xf32>
    %59 = vector.broadcast %cst_50 : f32 to vector<128x128xf32>
    %60 = arith.minimumf %59, %58 : vector<128x128xf32>
    %c0_51 = arith.constant 0 : index
    %c4_52 = arith.constant 4 : index
    %c0_53 = arith.constant 0 : index
    %c0_54 = arith.constant 0 : index
    %61 = vector.load %arg4[%c0_51, %c4_52, %c0_53, %c0_54] : memref<1x8x128x128xf32, #tpu.memory_space<vmem>>, vector<1x1x128x128xf32>
    %62 = vector.shape_cast %61 : vector<1x1x128x128xf32> to vector<128x128xf32>
    %63 = vector.shape_cast %60 : vector<128x128xf32> to vector<1x1x128x128xf32>
    tpu.vector_store %arg4[%c0_51, %c4_52, %c0_53, %c0_54], %63 {strides = array<i32>} : memref<1x8x128x128xf32, #tpu.memory_space<vmem>>, vector<1x1x128x128xf32>,
    %c5 = arith.constant 5 : index
    %c0_55 = arith.constant 0 : index
    %c0_56 = arith.constant 0 : index
    %64 = vector.load %arg2[%c5, %c0_55, %c0_56] : memref<8x128x128xbf16, #tpu.memory_space<vmem>>, vector<1x128x128xbf16>
    %65 = vector.shape_cast %64 : vector<1x128x128xbf16> to vector<128x128xbf16>
    %cst_57 = arith.constant dense<0.000000e+00> : vector<128x128xf32>
    %66 = tpu.matmul %1, %65, %cst_57 {dimension_numbers = #tpu.dot_dimension_numbers<[1], [0], [0], [1], [0, 0, 1, 1], [], []>} : vector<128x128xbf16>, vector<128x128xbf16>, vector<128x128xf32> -> vector<128x128xf32>
    %67 = arith.truncf %66 : vector<128x128xf32> to vector<128x128xbf16>
    %cst_58 = arith.constant dense<0.000000e+00> : vector<128x128xf32>
    %68 = tpu.matmul %67, %3, %cst_58 {dimension_numbers = #tpu.dot_dimension_numbers<[1], [0], [0], [1], [0, 0, 1, 1], [], []>} : vector<128x128xbf16>, vector<128x128xbf16>, vector<128x128xf32> -> vector<128x128xf32>
    %cst_59 = arith.constant 0.000000e+00 : f32
    %cst_60 = arith.constant 1.000000e+00 : f32
    %69 = vector.broadcast %cst_59 : f32 to vector<128x128xf32>
    %70 = arith.maximumf %69, %68 : vector<128x128xf32>
    %71 = vector.broadcast %cst_60 : f32 to vector<128x128xf32>
    %72 = arith.minimumf %71, %70 : vector<128x128xf32>
    %c0_61 = arith.constant 0 : index
    %c5_62 = arith.constant 5 : index
    %c0_63 = arith.constant 0 : index
    %c0_64 = arith.constant 0 : index
    %73 = vector.load %arg4[%c0_61, %c5_62, %c0_63, %c0_64] : memref<1x8x128x128xf32, #tpu.memory_space<vmem>>, vector<1x1x128x128xf32>
    %74 = vector.shape_cast %73 : vector<1x1x128x128xf32> to vector<128x128xf32>
    %75 = vector.shape_cast %72 : vector<128x128xf32> to vector<1x1x128x128xf32>
    tpu.vector_store %arg4[%c0_61, %c5_62, %c0_63, %c0_64], %75 {strides = array<i32>} : memref<1x8x128x128xf32, #tpu.memory_space<vmem>>, vector<1x1x128x128xf32>,
    %c6 = arith.constant 6 : index
    %c0_65 = arith.constant 0 : index
    %c0_66 = arith.constant 0 : index
    %76 = vector.load %arg2[%c6, %c0_65, %c0_66] : memref<8x128x128xbf16, #tpu.memory_space<vmem>>, vector<1x128x128xbf16>
    %77 = vector.shape_cast %76 : vector<1x128x128xbf16> to vector<128x128xbf16>
    %cst_67 = arith.constant dense<0.000000e+00> : vector<128x128xf32>
    %78 = tpu.matmul %1, %77, %cst_67 {dimension_numbers = #tpu.dot_dimension_numbers<[1], [0], [0], [1], [0, 0, 1, 1], [], []>} : vector<128x128xbf16>, vector<128x128xbf16>, vector<128x128xf32> -> vector<128x128xf32>
    %79 = arith.truncf %78 : vector<128x128xf32> to vector<128x128xbf16>
    %cst_68 = arith.constant dense<0.000000e+00> : vector<128x128xf32>
    %80 = tpu.matmul %79, %3, %cst_68 {dimension_numbers = #tpu.dot_dimension_numbers<[1], [0], [0], [1], [0, 0, 1, 1], [], []>} : vector<128x128xbf16>, vector<128x128xbf16>, vector<128x128xf32> -> vector<128x128xf32>
    %cst_69 = arith.constant 0.000000e+00 : f32
    %cst_70 = arith.constant 1.000000e+00 : f32
    %81 = vector.broadcast %cst_69 : f32 to vector<128x128xf32>
    %82 = arith.maximumf %81, %80 : vector<128x128xf32>
    %83 = vector.broadcast %cst_70 : f32 to vector<128x128xf32>
    %84 = arith.minimumf %83, %82 : vector<128x128xf32>
    %c0_71 = arith.constant 0 : index
    %c6_72 = arith.constant 6 : index
    %c0_73 = arith.constant 0 : index
    %c0_74 = arith.constant 0 : index
    %85 = vector.load %arg4[%c0_71, %c6_72, %c0_73, %c0_74] : memref<1x8x128x128xf32, #tpu.memory_space<vmem>>, vector<1x1x128x128xf32>
    %86 = vector.shape_cast %85 : vector<1x1x128x128xf32> to vector<128x128xf32>
    %87 = vector.shape_cast %84 : vector<128x128xf32> to vector<1x1x128x128xf32>
    tpu.vector_store %arg4[%c0_71, %c6_72, %c0_73, %c0_74], %87 {strides = array<i32>} : memref<1x8x128x128xf32, #tpu.memory_space<vmem>>, vector<1x1x128x128xf32>,
    %c7 = arith.constant 7 : index
    %c0_75 = arith.constant 0 : index
    %c0_76 = arith.constant 0 : index
    %88 = vector.load %arg2[%c7, %c0_75, %c0_76] : memref<8x128x128xbf16, #tpu.memory_space<vmem>>, vector<1x128x128xbf16>
    %89 = vector.shape_cast %88 : vector<1x128x128xbf16> to vector<128x128xbf16>
    %cst_77 = arith.constant dense<0.000000e+00> : vector<128x128xf32>
    %90 = tpu.matmul %1, %89, %cst_77 {dimension_numbers = #tpu.dot_dimension_numbers<[1], [0], [0], [1], [0, 0, 1, 1], [], []>} : vector<128x128xbf16>, vector<128x128xbf16>, vector<128x128xf32> -> vector<128x128xf32>
    %91 = arith.truncf %90 : vector<128x128xf32> to vector<128x128xbf16>
    %cst_78 = arith.constant dense<0.000000e+00> : vector<128x128xf32>
    %92 = tpu.matmul %91, %3, %cst_78 {dimension_numbers = #tpu.dot_dimension_numbers<[1], [0], [0], [1], [0, 0, 1, 1], [], []>} : vector<128x128xbf16>, vector<128x128xbf16>, vector<128x128xf32> -> vector<128x128xf32>
    %cst_79 = arith.constant 0.000000e+00 : f32
    %cst_80 = arith.constant 1.000000e+00 : f32
    %93 = vector.broadcast %cst_79 : f32 to vector<128x128xf32>
    %94 = arith.maximumf %93, %92 : vector<128x128xf32>
    %95 = vector.broadcast %cst_80 : f32 to vector<128x128xf32>
    %96 = arith.minimumf %95, %94 : vector<128x128xf32>
    %c0_81 = arith.constant 0 : index
    %c7_82 = arith.constant 7 : index
    %c0_83 = arith.constant 0 : index
    %c0_84 = arith.constant 0 : index
    %97 = vector.load %arg4[%c0_81, %c7_82, %c0_83, %c0_84] : memref<1x8x128x128xf32, #tpu.memory_space<vmem>>, vector<1x1x128x128xf32>
    %98 = vector.shape_cast %97 : vector<1x1x128x128xf32> to vector<128x128xf32>
    %99 = vector.shape_cast %96 : vector<128x128xf32> to vector<1x1x128x128xf32>
    tpu.vector_store %arg4[%c0_81, %c7_82, %c0_83, %c0_84], %99 {strides = array<i32>} : memref<1x8x128x128xf32, #tpu.memory_space<vmem>>, vector<1x1x128x128xf32>,
    return
  }
  func.func @transform_0(%arg0: i32) -> (i32, i32, i32) {
    %c0_i32 = arith.constant 0 : i32
    %c0_i32_0 = arith.constant 0 : i32
    %c0_i32_1 = arith.constant 0 : i32
    return %arg0, %c0_i32, %c0_i32_0 : i32, i32, i32
  }
  func.func @transform_1(%arg0: i32) -> (i32, i32, i32) {
    %c0_i32 = arith.constant 0 : i32
    %c0_i32_0 = arith.constant 0 : i32
    %c0_i32_1 = arith.constant 0 : i32
    %c0_i32_2 = arith.constant 0 : i32
    return %c0_i32, %c0_i32_0, %c0_i32_1 : i32, i32, i32
  }
  func.func @transform_2(%arg0: i32) -> (i32, i32, i32) {
    %c0_i32 = arith.constant 0 : i32
    %c0_i32_0 = arith.constant 0 : i32
    %c0_i32_1 = arith.constant 0 : i32
    return %arg0, %c0_i32, %c0_i32_0 : i32, i32, i32
  }
  func.func @transform_3(%arg0: i32) -> (i32, i32, i32, i32) {
    %c0_i32 = arith.constant 0 : i32
    %c0_i32_0 = arith.constant 0 : i32
    %c0_i32_1 = arith.constant 0 : i32
    %c0_i32_2 = arith.constant 0 : i32
    return %arg0, %c0_i32, %c0_i32_0, %c0_i32_1 : i32, i32, i32, i32
  }
}

</mosaic_0001>

<bundles_post_ra>
// kernel: make_cutouts_pallas.1
= control target key start
LH: loop header
LB: loop body
LE: loop exit
PB: predicated region body
PF: predicated region fallthrough
CT: control target
= control target key end

     0   :  { %8 = vsyncpa [#allocation3], 0  ;;  %s5052_s0 = inlined_call_operand.hbm [shape: bf16[4,128,128], index: 0, kind: input, shape index: {}]   ;;  %s5053_s1 = inlined_call_operand.vmem [shape: bf16[8,128,128], index: 1, kind: input, shape index: {}]   ;;  %s5054_s2 = inlined_call_operand.hbm [shape: bf16[4,128,128], index: 2, kind: input, shape index: {}]   ;;  %s5055_s3 = inlined_call_operand.vmem [shape: f32[4,8,128,128], index: 3, kind: output, shape index: {}]  }
   0x1   :  { %10 = vsyncpa [#allocation3 + $0x1], 0 }
   0x2   :  { %11 = vsyncpa [#allocation5], 0 }
   0x3   :  { %13 = vsyncpa [#allocation5 + $0x1], 0  ;;  %s4318_s12 = smov 0   ;;  %s4320_s13 = smov 0  }
   0x4   :  { %s4322_s14 = smov 0   ;;  %s4324_s15 = smov 0  }
   0x5 LB: > { %s4337_s16 = sadd.s32 4294967295, %s4292_s15   ;;  %s4340_s17 = sadd.s32 1, %s4292_s15   ;;  %s4292_s15 = sphi %s4324_s15, %s5065_s15   ;;  %s4288_s14 = sphi %s4322_s14, %s5064_s14   ;;  %s4284_s13 = sphi %s4320_s13, %s5063_s13   ;;  %s4280_s12 = sphi %s4318_s12, %s5062_s12  }
   0x6   : > { %s23_s18 = ssub.s32 %s4292_s15, %s4340_s17  ;;  %s26_s19 = sadd.s32 1, %s4288_s14 }
   0x7   : > { %p24_p0 = scmp.eq.s32.totalorder %s23_s18, 0  ;;  %p33_p1 = scmp.ne.s32.totalorder %s4288_s14, %s4284_s13 }
   0x8   : > { %p34_p2 = scmp.eq.s32.totalorder %s4292_s15, 0  ;;  %p39_p3 = scmp.ne.s32.totalorder %s4284_s13, %s4280_s12 }
   0x9   : > { %s4350_s20 = scalar_select %p24_p0, %s4288_s14, %s26_s19  }
   0xa   : > { %p35_p4 = por %p34_p2, %p33_p1  ;;  %p40_p5 = scmp.eq.s32.totalorder %s4337_s16, 0 }
   0xb   : > { %p4078_p6 = scmp.lt.s32.totalorder %s4292_s15, 4  ;;  %s4359_s22 = sand.u32 1, %s4288_s14  }
   0xc   : > { %p4354_p7 = por %p40_p5, %p39_p3  ;;  %s2979_s23 = sshll.u32 %s4359_s22, 6 }
   0xd   : > { %s3296_s24 = sshll.u32 %s4292_s15, 10  ;;  %s143_s28 = scalar_lea.vmem [#allocation2], %s2979_s23 }
   0xe   : > { %s5057_s21 = scalar_select %p4354_p7, 1, 0 }
   0xf   : > { %s4368_s27 = scalar_lea.hbm %s5052_s0, %s3296_s24  ;;  %s150_s29 = sshll.u32 %s143_s28, 4  ;;  %s4372_s29 = int_to_ptr.vmem [resolvable:$true] %s150_s29 }
  0x10   : > { %p4374_p8 = pnand %p4078_p6, %p35_p4  ;;  %s140_s4 = scalar_lea.sflag [#allocation3], %s4359_s22 }
  0x11   : > { %s4194_s5 = scalar_lea.hbm %s4368_s27, 1024  ;;  %s4199_s8 = scalar_lea.hbm %s5052_s0, 4096 }
  0x12   : > { %p4195_p10 = scmp.ne.s32.totalorder %s4368_s27, %s4194_s5  ;;  %p4196_p11 = pneg %p4374_p8 }
  0x13   : > { %p4200_p0 = scmp.lt.u32.totalorder %s4368_s27, %s5052_s0  ;;  %p4201_p1 = scmp.lt.u32.totalorder %s4199_s8, %s4194_s5 }
  0x14   : > { %p4197_p12 = pnand %p4196_p11, %p4195_p10  ;;  %p4203_p3 = scmp.lt.u32.totalorder %s4194_s5, %s4368_s27 }
  0x15   : > { %p4202_p2 = por %p4201_p1, %p4200_p0 }
  0x16   : > { %p4198_p13 = pneg %p4197_p12 }
  0x17   : > { %p4204_p4 = por %p4203_p3, %p4202_p2 }
  0x19   : > { %p4205_p5 = pnand %p4204_p4, %p4198_p13 }
  0x1b   : > { %4208 = shalt.err (!%p4205_p5)
}
  0x1c   : > { %s4209_s11 = scalar_lea.vmem %s4372_s29, 1024  ;;  %s4294_s12 = smov [#allocation2]  }
  0x1d   : > { %p4210_p6 = scmp.ne.s32.totalorder %s4372_s29, %s4209_s11  ;;  %s4214_s18 = sshll.u32 %s4294_s12, 4  ;;  %s4215_s18 = int_to_ptr.vmem [resolvable:$false] %s4214_s18 }
  0x1e   : > { %s4216_s19 = scalar_lea.vmem %s4215_s18, 2048  ;;  %p4217_p9 = scmp.lt.s32.totalorder %s4372_s29, %s4215_s18 }
  0x1f   : > { %p4212_p10 = pnand %p4210_p6, %p4196_p11  ;;  %p4218_p0 = scmp.lt.s32.totalorder %s4216_s19, %s4209_s11 }
  0x21   : > { %p4213_p12 = pneg %p4212_p10  ;;  %p4219_p1 = por %p4218_p0, %p4217_p9 }
  0x23   : > { %p4220_p2 = pnand %p4219_p1, %p4213_p12 }
  0x25   : > { %4223 = shalt.err (!%p4220_p2)
}
  0x26   : > { %s4295_s25 = smov 64   ;;  %s4296_s26 = smov 4  }
  0x27   : > { %4074 = dma.hbm_to_vmem [thread:$0]  (!%p4374_p8), %s4368_s27, 1024, %s4372_s29, %s140_s4, %s4295_s25, %s4295_s25, %s4296_s26  }
  0x28   : > { %p179_p9 = scmp.lt.s32.totalorder %s4292_s15, 5  ;;  %s4416_s6 = scalar_lea.hbm %s5054_s2, %s3296_s24 }
  0x29   : > { %p5059_p13 = scmp.ge.s32.totalorder %s4292_s15, 1  ;;  %s164_s8 = scalar_lea.vmem [#allocation4], %s2979_s23 }
  0x2a   : > { %s171_s9 = sshll.u32 %s164_s8, 4  ;;  %s161_s27 = scalar_lea.sflag [#allocation5], %s4359_s22  ;;  %s4426_s9 = int_to_ptr.vmem [resolvable:$true] %s171_s9 }
  0x2b   : > { %p4420_p3 = pnand %p5059_p13, %p179_p9  ;;  %s4224_s29 = scalar_lea.hbm %s4416_s6, 1024 }
  0x2c   : > { %p4225_p4 = scmp.ne.s32.totalorder %s4416_s6, %s4224_s29  ;;  %s4229_s4 = scalar_lea.hbm %s5054_s2, 4096 }
  0x2d   : > { %p4230_p10 = scmp.lt.u32.totalorder %s4416_s6, %s5054_s2  ;;  %p4231_p12 = scmp.lt.u32.totalorder %s4229_s4, %s4224_s29 }
  0x2e   : > { %p4227_p5 = pnand %p4225_p4, %p4196_p11  ;;  %p4233_p1 = scmp.lt.u32.totalorder %s4224_s29, %s4416_s6 }
  0x2f   : > { %p4232_p0 = por %p4231_p12, %p4230_p10 }
  0x30   : > { %p4228_p6 = pneg %p4227_p5 }
  0x31   : > { %p4234_p2 = por %p4233_p1, %p4232_p0 }
  0x33   : > { %p4235_p9 = pnand %p4234_p2, %p4228_p6 }
  0x35   : > { %4238 = shalt.err (!%p4235_p9)
}
  0x36   : > { %s4239_s23 = scalar_lea.vmem %s4426_s9, 1024  ;;  %s4297_s12 = smov [#allocation4]  }
  0x37   : > { %p4240_p13 = scmp.ne.s32.totalorder %s4426_s9, %s4239_s23  ;;  %s4244_s18 = sshll.u32 %s4297_s12, 4  ;;  %s4245_s18 = int_to_ptr.vmem [resolvable:$false] %s4244_s18 }
  0x38   : > { %s4246_s19 = scalar_lea.vmem %s4245_s18, 2048  ;;  %p4247_p7 = scmp.lt.s32.totalorder %s4426_s9, %s4245_s18 }
  0x39   : > { %p4242_p4 = pnand %p4240_p13, %p4196_p11  ;;  %p4248_p10 = scmp.lt.s32.totalorder %s4246_s19, %s4239_s23 }
  0x3b   : > { %p4243_p5 = pneg %p4242_p4  ;;  %p4249_p12 = por %p4248_p10, %p4247_p7 }
  0x3d   : > { %p4250_p0 = pnand %p4249_p12, %p4243_p5 }
  0x3f   : > { %4253 = shalt.err (!%p4250_p0)
}
  0x40   : > { %4077 = dma.hbm_to_vmem [thread:$0]  (!%p4374_p8), %s4416_s6, 1024, %s4426_s9, %s161_s27, %s4295_s25, %s4295_s25, %s4296_s26  }
  0x41   : > { %183 = sbr.rel (%p4420_p3) target bundleno = 794 (0x31a), region = 32  ;;  %s185_s28 = sand.u32 (!%p4420_p3), 1, %s4284_s13  }
  0x42   : > { %s2986_s5 = sshll.u32 (!%p4420_p3), %s185_s28, 6  ;;  %s186_s8 = scalar_lea.sflag (!%p4420_p3), [#allocation3], %s185_s28 }
  0x43   : > { %s4460_s29 = scalar_lea.vmem (!%p4420_p3), [#allocation2], %s2986_s5  ;;  %p5061_p7 = scmp.ne.s32.totalorder (!%p4420_p3), %s5057_s21, 0 }
  0x48   : > { %4271 = dma.done.wait (%p5061_p7), %s186_s8, 1024  }
  0x49   : > { %4273 = vsyncadd (%p5061_p7), %s186_s8, 4294966272  ;;  %s195_s22 = scalar_lea.sflag [#allocation5], %s185_s28  ;;  %s4466_s30 = scalar_lea.vmem [#allocation4], %s2986_s5 }
  0x4a   : > { %4275 = dma.done.wait (%p5061_p7), %s195_s22, 1024  }
  0x4b   : > { %4277 = vsyncadd (%p5061_p7), %s195_s22, 4294966272  ;;  %v4113_v0 = vld [vmem:[%s5053_s1] sm:$0xff]   ;;  %v4114_v1 = vld [vmem:[%s5053_s1 + $0x8] sm:$0xff]   ;;  %p226_p8 = scmp.lt.s32.totalorder %s4337_s16, 3 }
  0x4c   : > { %3555 = vmatprep.subr.bf16.mxu0 %v4113_v0  ;;  %v4115_v2 = vld [vmem:[%s5053_s1 + $0x10] sm:$0xff]   ;;  %v4116_v3 = vld [vmem:[%s5053_s1 + $0x18] sm:$0xff]   ;;  %v4485_v4 = vld [vmem:[%s4460_s29] sm:$0xff]  }
  0x4d   : > { %3556 = vmatpush3.bf16.msra.mxu0 %v4113_v0  ;;  %3571 = vmatprep.mubr.bf16.mxu0 %v4485_v4  ;;  %v4117_v5 = vld [vmem:[%s5053_s1 + $0x20] sm:$0xff]   ;;  %v4118_v6 = vld [vmem:[%s5053_s1 + $0x28] sm:$0xff]   ;;  %v4119_v7 = vld [vmem:[%s5053_s1 + $0x30] sm:$0xff]   ;;  %s5067_s16 = smov (!%p226_p8, %s4337_s16), 3 }
  0x4e   : > { %3557 = vmatprep.subr.bf16.mxu0 %v4114_v1  ;;  %v4120_v8 = vld [vmem:[%s5053_s1 + $0x38] sm:$0xff]   ;;  %v4123_v9 = vld [vmem:[%s5053_s1 + $0x40] sm:$0xff]   ;;  %v4504_v10 = vld [vmem:[%s4460_s29 + $0x8] sm:$0xff]   ;;  %s3298_s7 = sshll.u32 %s5067_s16, 10 }
  0x4f   : > { %v4507_v11 = vld [vmem:[%s4460_s29 + $0x10] sm:$0xff]   ;;  %v4124_v12 = vld [vmem:[%s5053_s1 + $0x48] sm:$0xff]   ;;  %v4518_v14 = vld [vmem:[%s4460_s29 + $0x18] sm:$0xff]   ;;  %s4904_s15 = scalar_lea.vmem %s5055_s3, %s3298_s7 }
  0x50   : > { %v4127_v13 = vld [vmem:[%s5053_s1 + $0x50] sm:$0xff]   ;;  %v4521_v15 = vld [vmem:[%s4460_s29 + $0x20] sm:$0xff]   ;;  %v4128_v16 = vld [vmem:[%s5053_s1 + $0x58] sm:$0xff]  }
  0x51   : > { %3558 = vmatpush3.bf16.msra.mxu0 %v4114_v1  ;;  %v4131_v17 = vld [vmem:[%s5053_s1 + $0x60] sm:$0xff]   ;;  %v4532_v18 = vld [vmem:[%s4460_s29 + $0x28] sm:$0xff]   ;;  %v4535_v19 = vld [vmem:[%s4460_s29 + $0x30] sm:$0xff]  }
  0x52   : > { %3559 = vmatprep.subr.bf16.mxu0 %v4115_v2  ;;  %v4132_v20 = vld [vmem:[%s5053_s1 + $0x68] sm:$0xff]   ;;  %v4135_v21 = vld [vmem:[%s5053_s1 + $0x70] sm:$0xff]   ;;  %v4546_v22 = vld [vmem:[%s4460_s29 + $0x38] sm:$0xff]  }
  0x53   : > { %v4136_v23 = vld [vmem:[%s5053_s1 + $0x78] sm:$0xff]   ;;  %v4137_v24 = vld [vmem:[%s5053_s1 + $0x80] sm:$0xff]   ;;  %v4138_v25 = vld [vmem:[%s5053_s1 + $0x88] sm:$0xff]  }
  0x54   : > { %v4139_v26 = vld [vmem:[%s5053_s1 + $0x90] sm:$0xff]   ;;  %v4140_v27 = vld [vmem:[%s5053_s1 + $0x98] sm:$0xff]   ;;  %v4141_v28 = vld [vmem:[%s5053_s1 + $0xa0] sm:$0xff]  }
  0x55   : > { %3560 = vmatpush3.bf16.msra.mxu0 %v4115_v2  ;;  %v4142_v29 = vld [vmem:[%s5053_s1 + $0xa8] sm:$0xff]   ;;  %v4143_v30 = vld [vmem:[%s5053_s1 + $0xb0] sm:$0xff]   ;;  %v4144_v31 = vld [vmem:[%s5053_s1 + $0xb8] sm:$0xff]  }
  0x56   : > { %3561 = vmatprep.subr.bf16.mxu0 %v4116_v3  ;;  %v4585_v32 = vld [vmem:[%s4466_s30] sm:$0xff]   ;;  %v4594_v34 = vld [vmem:[%s4466_s30 + $0x8] sm:$0xff]   ;;  %v4603_v36 = vld [vmem:[%s4466_s30 + $0x10] sm:$0xff]  }
  0x57   : > { %v4145_v33 = vld [vmem:[%s5053_s1 + $0xc0] sm:$0xff]   ;;  %3587 = vmatprep.subr.bf16.mxu1 %v4585_v32  ;;  %v4146_v35 = vld [vmem:[%s5053_s1 + $0xc8] sm:$0xff]   ;;  %v4147_v37 = vld [vmem:[%s5053_s1 + $0xd0] sm:$0xff]  }
  0x58   : > { %3588 = vmatpush3.bf16.msra.mxu1 %v4585_v32  ;;  %v4612_v38 = vld [vmem:[%s4466_s30 + $0x18] sm:$0xff]   ;;  %v4621_v40 = vld [vmem:[%s4466_s30 + $0x20] sm:$0xff]   ;;  %v4630_v42 = vld [vmem:[%s4466_s30 + $0x28] sm:$0xff]  }
  0x59   : > { %3562 = vmatpush3.bf16.msra.mxu0 %v4116_v3  ;;  %3589 = vmatprep.subr.bf16.mxu1 %v4594_v34  ;;  %v4148_v39 = vld [vmem:[%s5053_s1 + $0xd8] sm:$0xff]   ;;  %v4149_v41 = vld [vmem:[%s5053_s1 + $0xe0] sm:$0xff]   ;;  %v4150_v43 = vld [vmem:[%s5053_s1 + $0xe8] sm:$0xff]  }
  0x5a   : > { %3563 = vmatprep.subr.bf16.mxu0 %v4117_v5  ;;  %v4639_v44 = vld [vmem:[%s4466_s30 + $0x30] sm:$0xff]   ;;  %v4648_v46 = vld [vmem:[%s4466_s30 + $0x38] sm:$0xff]   ;;  %v4153_v48 = vld [vmem:[%s5053_s1 + $0x100] sm:$0xff]  }
  0x5b   : > { %v4151_v45 = vld [vmem:[%s5053_s1 + $0xf0] sm:$0xff]   ;;  %v4152_v47 = vld [vmem:[%s5053_s1 + $0xf8] sm:$0xff]   ;;  %v4154_v49 = vld [vmem:[%s5053_s1 + $0x108] sm:$0xff]  }
  0x5c   : > { %3590 = vmatpush3.bf16.msra.mxu1 %v4594_v34  ;;  %v4155_v50 = vld [vmem:[%s5053_s1 + $0x110] sm:$0xff]   ;;  %v4156_v51 = vld [vmem:[%s5053_s1 + $0x118] sm:$0xff]   ;;  %v4157_v52 = vld [vmem:[%s5053_s1 + $0x120] sm:$0xff]  }
  0x5d   : > { %3564 = vmatpush3.bf16.msra.mxu0 %v4117_v5  ;;  %3591 = vmatprep.subr.bf16.mxu1 %v4603_v36  ;;  %v4158_v53 = vld [vmem:[%s5053_s1 + $0x128] sm:$0xff]   ;;  %v4159_v54 = vld [vmem:[%s5053_s1 + $0x130] sm:$0xff]   ;;  %v4160_v55 = vld [vmem:[%s5053_s1 + $0x138] sm:$0xff]  }
  0x5e   : > { %3565 = vmatprep.subr.bf16.mxu0 %v4118_v6  ;;  %v4161_v56 = vld [vmem:[%s5053_s1 + $0x140] sm:$0xff]   ;;  %v4162_v57 = vld [vmem:[%s5053_s1 + $0x148] sm:$0xff]   ;;  %v4163_v58 = vld [vmem:[%s5053_s1 + $0x150] sm:$0xff]  }
  0x5f   : > { %v4164_v59 = vld [vmem:[%s5053_s1 + $0x158] sm:$0xff]   ;;  %v4165_v60 = vld [vmem:[%s5053_s1 + $0x160] sm:$0xff]   ;;  %v4166_v61 = vld [vmem:[%s5053_s1 + $0x168] sm:$0xff]  }
  0x60   : > { %3592 = vmatpush3.bf16.msra.mxu1 %v4603_v36  ;;  %v4167_v62 = vld [vmem:[%s5053_s1 + $0x170] sm:$0xff]   ;;  %v4168_v63 = vld [vmem:[%s5053_s1 + $0x178] sm:$0xff]   ;;  %v4169_v0 = vld [vmem:[%s5053_s1 + $0x180] sm:$0xff]  }
  0x61   : > { %3566 = vmatpush3.bf16.msra.mxu0 %v4118_v6  ;;  %3593 = vmatprep.subr.bf16.mxu1 %v4612_v38  ;;  %v4170_v1 = vld [vmem:[%s5053_s1 + $0x188] sm:$0xff]   ;;  %v4171_v2 = vld [vmem:[%s5053_s1 + $0x190] sm:$0xff]   ;;  %v4172_v3 = vld [vmem:[%s5053_s1 + $0x198] sm:$0xff]  }
  0x62   : > { %3567 = vmatprep.subr.bf16.mxu0 %v4119_v7  ;;  %v4173_v5 = vld [vmem:[%s5053_s1 + $0x1a0] sm:$0xff]   ;;  %v4174_v6 = vld [vmem:[%s5053_s1 + $0x1a8] sm:$0xff]  }
  0x64   : > { %3594 = vmatpush3.bf16.msra.mxu1 %v4612_v38 }
  0x65   : > { %3568 = vmatpush3.bf16.msra.mxu0 %v4119_v7  ;;  %3595 = vmatprep.subr.bf16.mxu1 %v4621_v40  ;;  %v4175_v7 = vld [vmem:[%s5053_s1 + $0x1b0] sm:$0xff]  }
  0x66   : > { %3569 = vmatprep.subr.bf16.mxu0 %v4120_v8 }
  0x68   : > { %3596 = vmatpush3.bf16.msra.mxu1 %v4621_v40 }
  0x69   : > { %3570 = vmatpush3.bf16.msra.mxu0 %v4120_v8  ;;  %3597 = vmatprep.subr.bf16.mxu1 %v4630_v42  ;;  %v4177_v8 = vld [vmem:[%s5053_s1 + $0x1b8] sm:$0xff]  }
  0x6a   : > { %3619 = vmatprep.subr.bf16.mxu0 %v4123_v9 }
  0x6c   : > { %3572 = vmatmul.mubr.bf16.vlgmr.msra.gmra.mrb[0].mxu0 %v4504_v10  ;;  %3598 = vmatpush3.bf16.msra.mxu1 %v4630_v42 }
  0x6d   : > { %3620 = vmatpush3.bf16.msra.mxu0 %v4123_v9  ;;  %3575 = vmatprep.mubr.bf16.mxu0 %v4507_v11  ;;  %v4179_v9 = vld [vmem:[%s5053_s1 + $0x1c0] sm:$0xff]  }
  0x6e   : > { %3621 = vmatprep.subr.bf16.mxu0 %v4124_v12  ;;  %3599 = vmatprep.subr.bf16.mxu1 %v4639_v44 }
  0x70   : > { %3600 = vmatpush3.bf16.msra.mxu1 %v4639_v44 }
  0x71   : > { %3622 = vmatpush3.bf16.msra.mxu0 %v4124_v12  ;;  %3601 = vmatprep.subr.bf16.mxu1 %v4648_v46  ;;  %v4181_v12 = vld [vmem:[%s5053_s1 + $0x1c8] sm:$0xff]  }
  0x72   : > { %3623 = vmatprep.subr.bf16.mxu0 %v4127_v13 }
  0x74   : > { %3576 = vmatmul.mubr.bf16.gmra.mrb[4].mxu0 %v4518_v14  ;;  %3602 = vmatpush3.bf16.msra.mxu1 %v4648_v46 }
  0x75   : > { %3624 = vmatpush3.bf16.msra.mxu0 %v4127_v13  ;;  %3579 = vmatprep.mubr.bf16.mxu0 %v4521_v15  ;;  %v4183_v13 = vld [vmem:[%s5053_s1 + $0x1d0] sm:$0xff]  }
  0x76   : > { %3625 = vmatprep.subr.bf16.mxu0 %v4128_v16  ;;  %3651 = vmatprep.subr.bf16.mxu1 %v4585_v32 }
  0x79   : > { %3626 = vmatpush3.bf16.msra.mxu0 %v4128_v16  ;;  %v4185_v16 = vld [vmem:[%s5053_s1 + $0x1d8] sm:$0xff]  }
  0x7a   : > { %3627 = vmatprep.subr.bf16.mxu0 %v4131_v17 }
  0x7c   : > { %3580 = vmatmul.mubr.bf16.gmra.mrb[8].mxu0 %v4532_v18 }
  0x7d   : > { %3628 = vmatpush3.bf16.msra.mxu0 %v4131_v17  ;;  %3583 = vmatprep.mubr.bf16.mxu0 %v4535_v19  ;;  %v4187_v17 = vld [vmem:[%s5053_s1 + $0x1e0] sm:$0xff]  }
  0x7e   : > { %3629 = vmatprep.subr.bf16.mxu0 %v4132_v20 }
  0x81   : > { %3630 = vmatpush3.bf16.msra.mxu0 %v4132_v20  ;;  %v4189_v20 = vld [vmem:[%s5053_s1 + $0x1e8] sm:$0xff]  }
  0x82   : > { %3631 = vmatprep.subr.bf16.mxu0 %v4135_v21 }
  0x84   : > { %3584 = vmatmul.mubr.bf16.gmra.mrb[12].mxu0 %v4546_v22 }
  0x85   : > { %3632 = vmatpush3.bf16.msra.mxu0 %v4135_v21  ;;  %3635 = vmatprep.mubr.bf16.mxu0 %v4485_v4  ;;  %v4191_v21 = vld [vmem:[%s5053_s1 + $0x1f0] sm:$0xff]  }
  0x86   : > { %3633 = vmatprep.subr.bf16.mxu0 %v4136_v23 }
  0x89   : > { %3634 = vmatpush3.bf16.msra.mxu0 %v4136_v23 }
  0x8a   : > { %3683 = vmatprep.subr.bf16.mxu0 %v4137_v24 }
  0x8c   : > { %3636 = vmatmul.mubr.bf16.vlgmr.msra.gmra.mrb[16].mxu0 %v4504_v10 }
  0x8d   : > { %3684 = vmatpush3.bf16.msra.mxu0 %v4137_v24  ;;  %3639 = vmatprep.mubr.bf16.mxu0 %v4507_v11 }
  0x8e   : > { %3685 = vmatprep.subr.bf16.mxu0 %v4138_v25 }
  0x91   : > { %3686 = vmatpush3.bf16.msra.mxu0 %v4138_v25 }
  0x92   : > { %3687 = vmatprep.subr.bf16.mxu0 %v4139_v26 }
  0x94   : > { %3640 = vmatmul.mubr.bf16.gmra.mrb[20].mxu0 %v4518_v14 }
  0x95   : > { %3688 = vmatpush3.bf16.msra.mxu0 %v4139_v26  ;;  %3643 = vmatprep.mubr.bf16.mxu0 %v4521_v15 }
  0x96   : > { %3689 = vmatprep.subr.bf16.mxu0 %v4140_v27 }
  0x99   : > { %3690 = vmatpush3.bf16.msra.mxu0 %v4140_v27 }
  0x9a   : > { %3691 = vmatprep.subr.bf16.mxu0 %v4141_v28 }
  0x9c   : > { %3644 = vmatmul.mubr.bf16.gmra.mrb[24].mxu0 %v4532_v18 }
  0x9d   : > { %3692 = vmatpush3.bf16.msra.mxu0 %v4141_v28  ;;  %3647 = vmatprep.mubr.bf16.mxu0 %v4535_v19  ;;  %v4192_v28 = vld [vmem:[%s5053_s1 + $0x1f8] sm:$0xff]  }
  0x9e   : > { %3693 = vmatprep.subr.bf16.mxu0 %v4142_v29 }
  0xa1   : > { %3694 = vmatpush3.bf16.msra.mxu0 %v4142_v29 }
  0xa2   : > { %3695 = vmatprep.subr.bf16.mxu0 %v4143_v30 }
  0xa4   : > { %3648 = vmatmul.mubr.bf16.gmra.mrb[28].mxu0 %v4546_v22 }
  0xa5   : > { %3696 = vmatpush3.bf16.msra.mxu0 %v4143_v30  ;;  %3699 = vmatprep.mubr.bf16.mxu0 %v4485_v4 }
  0xa6   : > { %3697 = vmatprep.subr.bf16.mxu0 %v4144_v31 }
  0xa9   : > { %3698 = vmatpush3.bf16.msra.mxu0 %v4144_v31 }
  0xaa   : > { %3747 = vmatprep.subr.bf16.mxu0 %v4145_v33 }
  0xac   : > { %3700 = vmatmul.mubr.bf16.vlgmr.msra.gmra.mrb[32].mxu0 %v4504_v10 }
  0xad   : > { %3748 = vmatpush3.bf16.msra.mxu0 %v4145_v33  ;;  %3703 = vmatprep.mubr.bf16.mxu0 %v4507_v11 }
  0xae   : > { %3749 = vmatprep.subr.bf16.mxu0 %v4146_v35 }
  0xb1   : > { %3750 = vmatpush3.bf16.msra.mxu0 %v4146_v35 }
  0xb2   : > { %3751 = vmatprep.subr.bf16.mxu0 %v4147_v37 }
  0xb4   : > { %3704 = vmatmul.mubr.bf16.gmra.mrb[36].mxu0 %v4518_v14 }
  0xb5   : > { %3752 = vmatpush3.bf16.msra.mxu0 %v4147_v37  ;;  %3707 = vmatprep.mubr.bf16.mxu0 %v4521_v15 }
  0xb6   : > { %3753 = vmatprep.subr.bf16.mxu0 %v4148_v39 }
  0xb9   : > { %3754 = vmatpush3.bf16.msra.mxu0 %v4148_v39 }
  0xba   : > { %3755 = vmatprep.subr.bf16.mxu0 %v4149_v41 }
  0xbc   : > { %3708 = vmatmul.mubr.bf16.gmra.mrb[40].mxu0 %v4532_v18 }
  0xbd   : > { %3756 = vmatpush3.bf16.msra.mxu0 %v4149_v41  ;;  %3711 = vmatprep.mubr.bf16.mxu0 %v4535_v19 }
  0xbe   : > { %3757 = vmatprep.subr.bf16.mxu0 %v4150_v43 }
  0xc1   : > { %3758 = vmatpush3.bf16.msra.mxu0 %v4150_v43 }
  0xc2   : > { %3759 = vmatprep.subr.bf16.mxu0 %v4151_v45 }
  0xc4   : > { %3712 = vmatmul.mubr.bf16.gmra.mrb[44].mxu0 %v4546_v22 }
  0xc5   : > { %3760 = vmatpush3.bf16.msra.mxu0 %v4151_v45  ;;  %3763 = vmatprep.mubr.bf16.mxu0 %v4485_v4 }
  0xc6   : > { %3761 = vmatprep.subr.bf16.mxu0 %v4152_v47 }
  0xc9   : > { %3762 = vmatpush3.bf16.msra.mxu0 %v4152_v47 }
  0xca   : > { %3811 = vmatprep.subr.bf16.mxu0 %v4153_v48 }
  0xcc   : > { %3764 = vmatmul.mubr.bf16.vlgmr.msra.gmra.mrb[48].mxu0 %v4504_v10 }
  0xcd   : > { %3812 = vmatpush3.bf16.msra.mxu0 %v4153_v48  ;;  %3767 = vmatprep.mubr.bf16.mxu0 %v4507_v11 }
  0xce   : > { %3813 = vmatprep.subr.bf16.mxu0 %v4154_v49 }
  0xd1   : > { %3814 = vmatpush3.bf16.msra.mxu0 %v4154_v49 }
  0xd2   : > { %3815 = vmatprep.subr.bf16.mxu0 %v4155_v50 }
  0xd4   : > { %3768 = vmatmul.mubr.bf16.gmra.mrb[52].mxu0 %v4518_v14 }
  0xd5   : > { %3816 = vmatpush3.bf16.msra.mxu0 %v4155_v50  ;;  %3771 = vmatprep.mubr.bf16.mxu0 %v4521_v15 }
  0xd6   : > { %3817 = vmatprep.subr.bf16.mxu0 %v4156_v51 }
  0xd9   : > { %3818 = vmatpush3.bf16.msra.mxu0 %v4156_v51 }
  0xda   : > { %3819 = vmatprep.subr.bf16.mxu0 %v4157_v52 }
  0xdc   : > { %3772 = vmatmul.mubr.bf16.gmra.mrb[56].mxu0 %v4532_v18 }
  0xdd   : > { %3820 = vmatpush3.bf16.msra.mxu0 %v4157_v52  ;;  %3775 = vmatprep.mubr.bf16.mxu0 %v4535_v19 }
  0xde   : > { %3821 = vmatprep.subr.bf16.mxu0 %v4158_v53 }
  0xe1   : > { %3822 = vmatpush3.bf16.msra.mxu0 %v4158_v53 }
  0xe2   : > { %3823 = vmatprep.subr.bf16.mxu0 %v4159_v54 }
  0xe4   : > { %3776 = vmatmul.mubr.bf16.gmra.mrb[60].mxu0 %v4546_v22 }
  0xe5   : > { %3824 = vmatpush3.bf16.msra.mxu0 %v4159_v54  ;;  %3827 = vmatprep.mubr.bf16.mxu0 %v4485_v4 }
  0xe6   : > { %3825 = vmatprep.subr.bf16.mxu0 %v4160_v55 }
  0xe9   : > { %3826 = vmatpush3.bf16.msra.mxu0 %v4160_v55 }
  0xea   : > { %3875 = vmatprep.subr.bf16.mxu0 %v4161_v56 }
  0xec   : > { %3828 = vmatmul.mubr.bf16.vlgmr.msra.gmra.mrb[64].mxu0 %v4504_v10 }
  0xed   : > { %3876 = vmatpush3.bf16.msra.mxu0 %v4161_v56  ;;  %3831 = vmatprep.mubr.bf16.mxu0 %v4507_v11 }
  0xee   : > { %3877 = vmatprep.subr.bf16.mxu0 %v4162_v57 }
  0xf1   : > { %3878 = vmatpush3.bf16.msra.mxu0 %v4162_v57 }
  0xf2   : > { %3879 = vmatprep.subr.bf16.mxu0 %v4163_v58 }
  0xf4   : > { %3832 = vmatmul.mubr.bf16.gmra.mrb[68].mxu0 %v4518_v14 }
  0xf5   : > { %3880 = vmatpush3.bf16.msra.mxu0 %v4163_v58  ;;  %3835 = vmatprep.mubr.bf16.mxu0 %v4521_v15 }
  0xf6   : > { %3881 = vmatprep.subr.bf16.mxu0 %v4164_v59 }
  0xf9   : > { %3882 = vmatpush3.bf16.msra.mxu0 %v4164_v59 }
  0xfa   : > { %3883 = vmatprep.subr.bf16.mxu0 %v4165_v60 }
  0xfc   : > { %3836 = vmatmul.mubr.bf16.gmra.mrb[72].mxu0 %v4532_v18 }
  0xfd   : > { %3884 = vmatpush3.bf16.msra.mxu0 %v4165_v60  ;;  %3839 = vmatprep.mubr.bf16.mxu0 %v4535_v19 }
  0xfe   : > { %3885 = vmatprep.subr.bf16.mxu0 %v4166_v61 }
 0x101   : > { %3886 = vmatpush3.bf16.msra.mxu0 %v4166_v61 }
 0x102   : > { %3887 = vmatprep.subr.bf16.mxu0 %v4167_v62 }
 0x104   : > { %3840 = vmatmul.mubr.bf16.gmra.mrb[76].mxu0 %v4546_v22 }
 0x105   : > { %3888 = vmatpush3.bf16.msra.mxu0 %v4167_v62  ;;  %3891 = vmatprep.mubr.bf16.mxu0 %v4485_v4 }
 0x106   : > { %3889 = vmatprep.subr.bf16.mxu0 %v4168_v63 }
 0x109   : > { %3890 = vmatpush3.bf16.msra.mxu0 %v4168_v63 }
 0x10a   : > { %3939 = vmatprep.subr.bf16.mxu0 %v4169_v0 }
 0x10c   : > { %3892 = vmatmul.mubr.bf16.vlgmr.msra.gmra.mrb[80].mxu0 %v4504_v10 }
 0x10d   : > { %3940 = vmatpush3.bf16.msra.mxu0 %v4169_v0  ;;  %3895 = vmatprep.mubr.bf16.mxu0 %v4507_v11 }
 0x10e   : > { %3941 = vmatprep.subr.bf16.mxu0 %v4170_v1 }
 0x111   : > { %3942 = vmatpush3.bf16.msra.mxu0 %v4170_v1 }
 0x112   : > { %3943 = vmatprep.subr.bf16.mxu0 %v4171_v2 }
 0x114   : > { %3896 = vmatmul.mubr.bf16.gmra.mrb[84].mxu0 %v4518_v14 }
 0x115   : > { %3944 = vmatpush3.bf16.msra.mxu0 %v4171_v2  ;;  %3899 = vmatprep.mubr.bf16.mxu0 %v4521_v15 }
 0x116   : > { %3945 = vmatprep.subr.bf16.mxu0 %v4172_v3 }
 0x119   : > { %3946 = vmatpush3.bf16.msra.mxu0 %v4172_v3 }
 0x11a   : > { %3947 = vmatprep.subr.bf16.mxu0 %v4173_v5 }
 0x11c   : > { %3900 = vmatmul.mubr.bf16.gmra.mrb[88].mxu0 %v4532_v18 }
 0x11d   : > { %3948 = vmatpush3.bf16.msra.mxu0 %v4173_v5  ;;  %3903 = vmatprep.mubr.bf16.mxu0 %v4535_v19 }
 0x11e   : > { %3949 = vmatprep.subr.bf16.mxu0 %v4174_v6 }
 0x121   : > { %3950 = vmatpush3.bf16.msra.mxu0 %v4174_v6 }
 0x122   : > { %3951 = vmatprep.subr.bf16.mxu0 %v4175_v7 }
 0x124   : > { %3904 = vmatmul.mubr.bf16.gmra.mrb[92].mxu0 %v4546_v22 }
 0x125   : > { %3952 = vmatpush3.bf16.msra.mxu0 %v4175_v7  ;;  %3955 = vmatprep.mubr.bf16.mxu0 %v4485_v4 }
 0x126   : > { %3953 = vmatprep.subr.bf16.mxu0 %v4177_v8 }
 0x129   : > { %3954 = vmatpush3.bf16.msra.mxu0 %v4177_v8 }
 0x12a   : > { %4003 = vmatprep.subr.bf16.mxu0 %v4179_v9 }
 0x12c   : > { %3956 = vmatmul.mubr.bf16.vlgmr.msra.gmra.mrb[96].mxu0 %v4504_v10 }
 0x12d   : > { %4004 = vmatpush3.bf16.msra.mxu0 %v4179_v9  ;;  %3959 = vmatprep.mubr.bf16.mxu0 %v4507_v11 }
 0x12e   : > { %4005 = vmatprep.subr.bf16.mxu0 %v4181_v12 }
 0x131   : > { %4006 = vmatpush3.bf16.msra.mxu0 %v4181_v12 }
 0x132   : > { %4007 = vmatprep.subr.bf16.mxu0 %v4183_v13 }
 0x134   : > { %3960 = vmatmul.mubr.bf16.gmra.mrb[100].mxu0 %v4518_v14 }
 0x135   : > { %4008 = vmatpush3.bf16.msra.mxu0 %v4183_v13  ;;  %3963 = vmatprep.mubr.bf16.mxu0 %v4521_v15 }
 0x136   : > { %4009 = vmatprep.subr.bf16.mxu0 %v4185_v16 }
 0x139   : > { %4010 = vmatpush3.bf16.msra.mxu0 %v4185_v16 }
 0x13a   : > { %4011 = vmatprep.subr.bf16.mxu0 %v4187_v17 }
 0x13c   : > { %3964 = vmatmul.mubr.bf16.gmra.mrb[104].mxu0 %v4532_v18 }
 0x13d   : > { %4012 = vmatpush3.bf16.msra.mxu0 %v4187_v17  ;;  %3967 = vmatprep.mubr.bf16.mxu0 %v4535_v19 }
 0x13e   : > { %4013 = vmatprep.subr.bf16.mxu0 %v4189_v20 }
 0x13f   : > { %v3573_v23 = vpop.f32.mrb[0].mxu0 }
 0x140   : > { %v410_v24 = vpop.f32.mrb[1].mxu0 }
 0x141   : > { %v3574_v25 = vpop.f32.mrb[2].mxu0  ;;  %4014 = vmatpush3.bf16.msra.mxu0 %v4189_v20 }
 0x142   : > { %v474_v26 = vpack.c.bf16 %v3574_v25, %v3573_v23  ;;  %v413_v27 = vpop.f32.mrb[3].mxu0  ;;  %4015 = vmatprep.subr.bf16.mxu0 %v4191_v21 }
 0x143   : > { %v473_v29 = vpack.c.bf16 %v413_v27, %v410_v24 }
 0x144   : > { %3968 = vmatmul.mubr.bf16.gmra.mrb[108].mxu0 %v4546_v22 }
 0x145   : > { %3603 = vmatprep.mubr.bf16.mxu1 %v473_v29  ;;  %4016 = vmatpush3.bf16.msra.mxu0 %v4191_v21 }
 0x146   : > { %3604 = vmatmul.mubr.bf16.vlgmr.msra.gmra.mrb[0].mxu1 %v474_v26  ;;  %4017 = vmatprep.subr.bf16.mxu0 %v4192_v28 }
 0x147   : > { %v3577_v30 = vpop.f32.mrb[4].mxu0  ;;  %3652 = vmatpush3.bf16.msra.mxu1 %v4585_v32  ;;  %4019 = vmatprep.mubr.bf16.mxu0 %v4485_v4 }
 0x148   : > { %v426_v31 = vpop.f32.mrb[5].mxu0  ;;  %3653 = vmatprep.subr.bf16.mxu1 %v4594_v34 }
 0x149   : > { %v3578_v33 = vpop.f32.mrb[6].mxu0  ;;  %4018 = vmatpush3.bf16.msra.mxu0 %v4192_v28 }
 0x14a   : > { %v476_v35 = vpack.c.bf16 %v3578_v33, %v3577_v30  ;;  %v429_v37 = vpop.f32.mrb[7].mxu0 }
 0x14b   : > { %v475_v39 = vpack.c.bf16 %v429_v37, %v426_v31  ;;  %3654 = vmatpush3.bf16.msra.mxu1 %v4594_v34 }
 0x14c   : > { %4020 = vmatmul.mubr.bf16.vlgmr.msra.gmra.mrb[112].mxu0 %v4504_v10  ;;  %3655 = vmatprep.subr.bf16.mxu1 %v4603_v36 }
 0x14d   : > { %3607 = vmatprep.mubr.bf16.mxu1 %v475_v39  ;;  %4023 = vmatprep.mubr.bf16.mxu0 %v4507_v11 }
 0x14e   : > { %3608 = vmatmul.mubr.bf16.gmra.mrb[4].mxu1 %v476_v35 }
 0x14f   : > { %v3581_v41 = vpop.f32.mrb[8].mxu0  ;;  %3656 = vmatpush3.bf16.msra.mxu1 %v4603_v36 }
 0x150   : > { %v442_v4 = vpop.f32.mrb[9].mxu0  ;;  %3657 = vmatprep.subr.bf16.mxu1 %v4612_v38 }
 0x151   : > { %v3582_v43 = vpop.f32.mrb[10].mxu0 }
 0x152   : > { %v478_v45 = vpack.c.bf16 %v3582_v43, %v3581_v41  ;;  %v445_v47 = vpop.f32.mrb[11].mxu0 }
 0x153   : > { %v477_v48 = vpack.c.bf16 %v445_v47, %v442_v4  ;;  %3658 = vmatpush3.bf16.msra.mxu1 %v4612_v38 }
 0x154   : > { %4024 = vmatmul.mubr.bf16.gmra.mrb[116].mxu0 %v4518_v14  ;;  %3659 = vmatprep.subr.bf16.mxu1 %v4621_v40 }
 0x155   : > { %3611 = vmatprep.mubr.bf16.mxu1 %v477_v48  ;;  %4027 = vmatprep.mubr.bf16.mxu0 %v4521_v15 }
 0x156   : > { %3612 = vmatmul.mubr.bf16.gmra.mrb[8].mxu1 %v478_v45 }
 0x157   : > { %v3585_v10 = vpop.f32.mrb[12].mxu0  ;;  %3660 = vmatpush3.bf16.msra.mxu1 %v4621_v40 }
 0x158   : > { %v458_v11 = vpop.f32.mrb[13].mxu0  ;;  %3661 = vmatprep.subr.bf16.mxu1 %v4630_v42 }
 0x159   : > { %v3586_v49 = vpop.f32.mrb[14].mxu0 }
 0x15a   : > { %v480_v50 = vpack.c.bf16 %v3586_v49, %v3585_v10  ;;  %v461_v51 = vpop.f32.mrb[15].mxu0 }
 0x15b   : > { %v479_v52 = vpack.c.bf16 %v461_v51, %v458_v11  ;;  %3662 = vmatpush3.bf16.msra.mxu1 %v4630_v42 }
 0x15c   : > { %4028 = vmatmul.mubr.bf16.gmra.mrb[120].mxu0 %v4532_v18  ;;  %3663 = vmatprep.subr.bf16.mxu1 %v4639_v44 }
 0x15d   : > { %3615 = vmatprep.mubr.bf16.mxu1 %v479_v52  ;;  %4031 = vmatprep.mubr.bf16.mxu0 %v4535_v19 }
 0x15e   : > { %3616 = vmatmul.mubr.bf16.gmra.mrb[12].mxu1 %v480_v50 }
 0x15f   : > { %v3637_v14 = vpop.f32.mrb[16].mxu0  ;;  %3664 = vmatpush3.bf16.msra.mxu1 %v4639_v44 }
 0x160   : > { %v773_v15 = vpop.f32.mrb[17].mxu0  ;;  %3665 = vmatprep.subr.bf16.mxu1 %v4648_v46 }
 0x161   : > { %v3638_v53 = vpop.f32.mrb[18].mxu0 }
 0x162   : > { %v837_v54 = vpack.c.bf16 %v3638_v53, %v3637_v14  ;;  %v776_v55 = vpop.f32.mrb[19].mxu0 }
 0x163   : > { %v836_v56 = vpack.c.bf16 %v776_v55, %v773_v15  ;;  %3666 = vmatpush3.bf16.msra.mxu1 %v4648_v46 }
 0x164   : > { %4032 = vmatmul.mubr.bf16.gmra.mrb[124].mxu0 %v4546_v22  ;;  %3715 = vmatprep.subr.bf16.mxu1 %v4585_v32 }
 0x165   : > { %3667 = vmatprep.mubr.bf16.mxu1 %v836_v56 }
 0x166   : > { %3668 = vmatmul.mubr.bf16.vlgmr.msra.gmra.mrb[16].mxu1 %v837_v54 }
 0x167   : > { %v3641_v18 = vpop.f32.mrb[20].mxu0  ;;  %3716 = vmatpush3.bf16.msra.mxu1 %v4585_v32 }
 0x168   : > { %v789_v19 = vpop.f32.mrb[21].mxu0  ;;  %3717 = vmatprep.subr.bf16.mxu1 %v4594_v34 }
 0x169   : > { %v3642_v57 = vpop.f32.mrb[22].mxu0 }
 0x16a   : > { %v839_v58 = vpack.c.bf16 %v3642_v57, %v3641_v18  ;;  %v792_v59 = vpop.f32.mrb[23].mxu0 }
 0x16b   : > { %v838_v60 = vpack.c.bf16 %v792_v59, %v789_v19  ;;  %3718 = vmatpush3.bf16.msra.mxu1 %v4594_v34 }
 0x16c   : > { %3719 = vmatprep.subr.bf16.mxu1 %v4603_v36 }
 0x16d   : > { %3671 = vmatprep.mubr.bf16.mxu1 %v838_v60 }
 0x16e   : > { %3672 = vmatmul.mubr.bf16.gmra.mrb[20].mxu1 %v839_v58 }
 0x16f   : > { %v3645_v22 = vpop.f32.mrb[24].mxu0  ;;  %3720 = vmatpush3.bf16.msra.mxu1 %v4603_v36 }
 0x170   : > { %v805_v61 = vpop.f32.mrb[25].mxu0  ;;  %3721 = vmatprep.subr.bf16.mxu1 %v4612_v38 }
 0x171   : > { %v3646_v62 = vpop.f32.mrb[26].mxu0 }
 0x172   : > { %v841_v63 = vpack.c.bf16 %v3646_v62, %v3645_v22  ;;  %v808_v0 = vpop.f32.mrb[27].mxu0 }
 0x173   : > { %v840_v1 = vpack.c.bf16 %v808_v0, %v805_v61  ;;  %3722 = vmatpush3.bf16.msra.mxu1 %v4612_v38 }
 0x174   : > { %3723 = vmatprep.subr.bf16.mxu1 %v4621_v40 }
 0x175   : > { %3675 = vmatprep.mubr.bf16.mxu1 %v840_v1 }
 0x176   : > { %3676 = vmatmul.mubr.bf16.gmra.mrb[24].mxu1 %v841_v63 }
 0x177   : > { %v3649_v2 = vpop.f32.mrb[28].mxu0  ;;  %3724 = vmatpush3.bf16.msra.mxu1 %v4621_v40 }
 0x178   : > { %v821_v3 = vpop.f32.mrb[29].mxu0  ;;  %3725 = vmatprep.subr.bf16.mxu1 %v4630_v42 }
 0x179   : > { %v3650_v5 = vpop.f32.mrb[30].mxu0 }
 0x17a   : > { %v843_v6 = vpack.c.bf16 %v3650_v5, %v3649_v2  ;;  %v824_v7 = vpop.f32.mrb[31].mxu0 }
 0x17b   : > { %v842_v8 = vpack.c.bf16 %v824_v7, %v821_v3  ;;  %3726 = vmatpush3.bf16.msra.mxu1 %v4630_v42 }
 0x17c   : > { %3727 = vmatprep.subr.bf16.mxu1 %v4639_v44 }
 0x17d   : > { %3679 = vmatprep.mubr.bf16.mxu1 %v842_v8 }
 0x17e   : > { %3680 = vmatmul.mubr.bf16.gmra.mrb[28].mxu1 %v843_v6 }
 0x17f   : > { %v3701_v9 = vpop.f32.mrb[32].mxu0  ;;  %3728 = vmatpush3.bf16.msra.mxu1 %v4639_v44 }
 0x180   : > { %v1089_v12 = vpop.f32.mrb[33].mxu0  ;;  %3729 = vmatprep.subr.bf16.mxu1 %v4648_v46 }
 0x181   : > { %v3702_v13 = vpop.f32.mrb[34].mxu0 }
 0x182   : > { %v1153_v16 = vpack.c.bf16 %v3702_v13, %v3701_v9  ;;  %v1092_v17 = vpop.f32.mrb[35].mxu0 }
 0x183   : > { %v1152_v20 = vpack.c.bf16 %v1092_v17, %v1089_v12  ;;  %3730 = vmatpush3.bf16.msra.mxu1 %v4648_v46 }
 0x184   : > { %3779 = vmatprep.subr.bf16.mxu1 %v4585_v32 }
 0x185   : > { %3731 = vmatprep.mubr.bf16.mxu1 %v1152_v20 }
 0x186   : > { %3732 = vmatmul.mubr.bf16.vlgmr.msra.gmra.mrb[32].mxu1 %v1153_v16 }
 0x187   : > { %v3705_v21 = vpop.f32.mrb[36].mxu0  ;;  %3780 = vmatpush3.bf16.msra.mxu1 %v4585_v32 }
 0x188   : > { %v1105_v23 = vpop.f32.mrb[37].mxu0  ;;  %3781 = vmatprep.subr.bf16.mxu1 %v4594_v34 }
 0x189   : > { %v3706_v24 = vpop.f32.mrb[38].mxu0 }
 0x18a   : > { %v1155_v25 = vpack.c.bf16 %v3706_v24, %v3705_v21  ;;  %v1108_v26 = vpop.f32.mrb[39].mxu0 }
 0x18b   : > { %v1154_v27 = vpack.c.bf16 %v1108_v26, %v1105_v23  ;;  %3782 = vmatpush3.bf16.msra.mxu1 %v4594_v34 }
 0x18c   : > { %3783 = vmatprep.subr.bf16.mxu1 %v4603_v36 }
 0x18d   : > { %3735 = vmatprep.mubr.bf16.mxu1 %v1154_v27 }
 0x18e   : > { %3736 = vmatmul.mubr.bf16.gmra.mrb[36].mxu1 %v1155_v25 }
 0x18f   : > { %v3709_v28 = vpop.f32.mrb[40].mxu0  ;;  %3784 = vmatpush3.bf16.msra.mxu1 %v4603_v36 }
 0x190   : > { %v1121_v29 = vpop.f32.mrb[41].mxu0  ;;  %3785 = vmatprep.subr.bf16.mxu1 %v4612_v38 }
 0x191   : > { %v3710_v30 = vpop.f32.mrb[42].mxu0 }
 0x192   : > { %v1157_v31 = vpack.c.bf16 %v3710_v30, %v3709_v28  ;;  %v1124_v33 = vpop.f32.mrb[43].mxu0 }
 0x193   : > { %v1156_v35 = vpack.c.bf16 %v1124_v33, %v1121_v29  ;;  %3786 = vmatpush3.bf16.msra.mxu1 %v4612_v38 }
 0x194   : > { %3787 = vmatprep.subr.bf16.mxu1 %v4621_v40 }
 0x195   : > { %3739 = vmatprep.mubr.bf16.mxu1 %v1156_v35 }
 0x196   : > { %3740 = vmatmul.mubr.bf16.gmra.mrb[40].mxu1 %v1157_v31 }
 0x197   : > { %v3713_v37 = vpop.f32.mrb[44].mxu0  ;;  %3788 = vmatpush3.bf16.msra.mxu1 %v4621_v40 }
 0x198   : > { %v1137_v39 = vpop.f32.mrb[45].mxu0  ;;  %3789 = vmatprep.subr.bf16.mxu1 %v4630_v42 }
 0x199   : > { %v3714_v41 = vpop.f32.mrb[46].mxu0 }
 0x19a   : > { %v1159_v4 = vpack.c.bf16 %v3714_v41, %v3713_v37  ;;  %v1140_v43 = vpop.f32.mrb[47].mxu0 }
 0x19b   : > { %v1158_v45 = vpack.c.bf16 %v1140_v43, %v1137_v39  ;;  %3790 = vmatpush3.bf16.msra.mxu1 %v4630_v42 }
 0x19c   : > { %3791 = vmatprep.subr.bf16.mxu1 %v4639_v44 }
 0x19d   : > { %3743 = vmatprep.mubr.bf16.mxu1 %v1158_v45 }
 0x19e   : > { %3744 = vmatmul.mubr.bf16.gmra.mrb[44].mxu1 %v1159_v4 }
 0x19f   : > { %v3765_v47 = vpop.f32.mrb[48].mxu0  ;;  %3792 = vmatpush3.bf16.msra.mxu1 %v4639_v44 }
 0x1a0   : > { %v1405_v48 = vpop.f32.mrb[49].mxu0  ;;  %3793 = vmatprep.subr.bf16.mxu1 %v4648_v46 }
 0x1a1   : > { %v3766_v10 = vpop.f32.mrb[50].mxu0 }
 0x1a2   : > { %v1469_v11 = vpack.c.bf16 %v3766_v10, %v3765_v47  ;;  %v1408_v49 = vpop.f32.mrb[51].mxu0 }
 0x1a3   : > { %v1468_v50 = vpack.c.bf16 %v1408_v49, %v1405_v48  ;;  %3794 = vmatpush3.bf16.msra.mxu1 %v4648_v46 }
 0x1a4   : > { %3843 = vmatprep.subr.bf16.mxu1 %v4585_v32 }
 0x1a5   : > { %3795 = vmatprep.mubr.bf16.mxu1 %v1468_v50 }
 0x1a6   : > { %3796 = vmatmul.mubr.bf16.vlgmr.msra.gmra.mrb[48].mxu1 %v1469_v11 }
 0x1a7   : > { %v3769_v51 = vpop.f32.mrb[52].mxu0  ;;  %3844 = vmatpush3.bf16.msra.mxu1 %v4585_v32 }
 0x1a8   : > { %v1421_v52 = vpop.f32.mrb[53].mxu0  ;;  %3845 = vmatprep.subr.bf16.mxu1 %v4594_v34 }
 0x1a9   : > { %v3770_v14 = vpop.f32.mrb[54].mxu0 }
 0x1aa   : > { %v1471_v15 = vpack.c.bf16 %v3770_v14, %v3769_v51  ;;  %v1424_v53 = vpop.f32.mrb[55].mxu0 }
 0x1ab   : > { %v1470_v54 = vpack.c.bf16 %v1424_v53, %v1421_v52  ;;  %3846 = vmatpush3.bf16.msra.mxu1 %v4594_v34 }
 0x1ac   : > { %3847 = vmatprep.subr.bf16.mxu1 %v4603_v36 }
 0x1ad   : > { %3799 = vmatprep.mubr.bf16.mxu1 %v1470_v54 }
 0x1ae   : > { %3800 = vmatmul.mubr.bf16.gmra.mrb[52].mxu1 %v1471_v15 }
 0x1af   : > { %v3773_v55 = vpop.f32.mrb[56].mxu0  ;;  %3848 = vmatpush3.bf16.msra.mxu1 %v4603_v36 }
 0x1b0   : > { %v1437_v56 = vpop.f32.mrb[57].mxu0  ;;  %3849 = vmatprep.subr.bf16.mxu1 %v4612_v38 }
 0x1b1   : > { %v3774_v18 = vpop.f32.mrb[58].mxu0 }
 0x1b2   : > { %v1473_v19 = vpack.c.bf16 %v3774_v18, %v3773_v55  ;;  %v1440_v57 = vpop.f32.mrb[59].mxu0 }
 0x1b3   : > { %v1472_v58 = vpack.c.bf16 %v1440_v57, %v1437_v56  ;;  %3850 = vmatpush3.bf16.msra.mxu1 %v4612_v38 }
 0x1b4   : > { %3851 = vmatprep.subr.bf16.mxu1 %v4621_v40 }
 0x1b5   : > { %3803 = vmatprep.mubr.bf16.mxu1 %v1472_v58 }
 0x1b6   : > { %3804 = vmatmul.mubr.bf16.gmra.mrb[56].mxu1 %v1473_v19 }
 0x1b7   : > { %v3777_v59 = vpop.f32.mrb[60].mxu0  ;;  %3852 = vmatpush3.bf16.msra.mxu1 %v4621_v40 }
 0x1b8   : > { %v1453_v60 = vpop.f32.mrb[61].mxu0  ;;  %3853 = vmatprep.subr.bf16.mxu1 %v4630_v42 }
 0x1b9   : > { %v3778_v22 = vpop.f32.mrb[62].mxu0 }
 0x1ba   : > { %v1475_v61 = vpack.c.bf16 %v3778_v22, %v3777_v59  ;;  %v1456_v62 = vpop.f32.mrb[63].mxu0 }
 0x1bb   : > { %v1474_v63 = vpack.c.bf16 %v1456_v62, %v1453_v60  ;;  %3854 = vmatpush3.bf16.msra.mxu1 %v4630_v42 }
 0x1bc   : > { %3855 = vmatprep.subr.bf16.mxu1 %v4639_v44 }
 0x1bd   : > { %3807 = vmatprep.mubr.bf16.mxu1 %v1474_v63 }
 0x1be   : > { %3808 = vmatmul.mubr.bf16.gmra.mrb[60].mxu1 %v1475_v61 }
 0x1bf   : > { %v3829_v0 = vpop.f32.mrb[64].mxu0  ;;  %3856 = vmatpush3.bf16.msra.mxu1 %v4639_v44 }
 0x1c0   : > { %v1721_v1 = vpop.f32.mrb[65].mxu0  ;;  %3857 = vmatprep.subr.bf16.mxu1 %v4648_v46 }
 0x1c1   : > { %v3830_v2 = vpop.f32.mrb[66].mxu0 }
 0x1c2   : > { %v1785_v3 = vpack.c.bf16 %v3830_v2, %v3829_v0  ;;  %v1724_v5 = vpop.f32.mrb[67].mxu0 }
 0x1c3   : > { %v1784_v6 = vpack.c.bf16 %v1724_v5, %v1721_v1  ;;  %3858 = vmatpush3.bf16.msra.mxu1 %v4648_v46 }
 0x1c4   : > { %3907 = vmatprep.subr.bf16.mxu1 %v4585_v32 }
 0x1c5   : > { %3859 = vmatprep.mubr.bf16.mxu1 %v1784_v6 }
 0x1c6   : > { %3860 = vmatmul.mubr.bf16.vlgmr.msra.gmra.mrb[64].mxu1 %v1785_v3 }
 0x1c7   : > { %v3833_v7 = vpop.f32.mrb[68].mxu0  ;;  %3908 = vmatpush3.bf16.msra.mxu1 %v4585_v32 }
 0x1c8   : > { %v1737_v8 = vpop.f32.mrb[69].mxu0  ;;  %3909 = vmatprep.subr.bf16.mxu1 %v4594_v34 }
 0x1c9   : > { %v3834_v9 = vpop.f32.mrb[70].mxu0 }
 0x1ca   : > { %v1787_v12 = vpack.c.bf16 %v3834_v9, %v3833_v7  ;;  %v1740_v13 = vpop.f32.mrb[71].mxu0 }
 0x1cb   : > { %v1786_v16 = vpack.c.bf16 %v1740_v13, %v1737_v8  ;;  %3910 = vmatpush3.bf16.msra.mxu1 %v4594_v34 }
 0x1cc   : > { %3911 = vmatprep.subr.bf16.mxu1 %v4603_v36 }
 0x1cd   : > { %3863 = vmatprep.mubr.bf16.mxu1 %v1786_v16 }
 0x1ce   : > { %3864 = vmatmul.mubr.bf16.gmra.mrb[68].mxu1 %v1787_v12 }
 0x1cf   : > { %v3837_v17 = vpop.f32.mrb[72].mxu0  ;;  %3912 = vmatpush3.bf16.msra.mxu1 %v4603_v36 }
 0x1d0   : > { %v1753_v20 = vpop.f32.mrb[73].mxu0  ;;  %3913 = vmatprep.subr.bf16.mxu1 %v4612_v38 }
 0x1d1   : > { %v3838_v21 = vpop.f32.mrb[74].mxu0 }
 0x1d2   : > { %v1789_v23 = vpack.c.bf16 %v3838_v21, %v3837_v17  ;;  %v1756_v24 = vpop.f32.mrb[75].mxu0 }
 0x1d3   : > { %v1788_v25 = vpack.c.bf16 %v1756_v24, %v1753_v20  ;;  %3914 = vmatpush3.bf16.msra.mxu1 %v4612_v38 }
 0x1d4   : > { %3915 = vmatprep.subr.bf16.mxu1 %v4621_v40 }
 0x1d5   : > { %3867 = vmatprep.mubr.bf16.mxu1 %v1788_v25 }
 0x1d6   : > { %3868 = vmatmul.mubr.bf16.gmra.mrb[72].mxu1 %v1789_v23 }
 0x1d7   : > { %v3841_v26 = vpop.f32.mrb[76].mxu0  ;;  %3916 = vmatpush3.bf16.msra.mxu1 %v4621_v40 }
 0x1d8   : > { %v1769_v27 = vpop.f32.mrb[77].mxu0  ;;  %3917 = vmatprep.subr.bf16.mxu1 %v4630_v42 }
 0x1d9   : > { %v3842_v28 = vpop.f32.mrb[78].mxu0 }
 0x1da   : > { %v1791_v29 = vpack.c.bf16 %v3842_v28, %v3841_v26  ;;  %v1772_v30 = vpop.f32.mrb[79].mxu0 }
 0x1db   : > { %v1790_v31 = vpack.c.bf16 %v1772_v30, %v1769_v27  ;;  %3918 = vmatpush3.bf16.msra.mxu1 %v4630_v42 }
 0x1dc   : > { %3919 = vmatprep.subr.bf16.mxu1 %v4639_v44 }
 0x1dd   : > { %3871 = vmatprep.mubr.bf16.mxu1 %v1790_v31 }
 0x1de   : > { %3872 = vmatmul.mubr.bf16.gmra.mrb[76].mxu1 %v1791_v29 }
 0x1df   : > { %v3893_v33 = vpop.f32.mrb[80].mxu0  ;;  %3920 = vmatpush3.bf16.msra.mxu1 %v4639_v44 }
 0x1e0   : > { %v2037_v35 = vpop.f32.mrb[81].mxu0  ;;  %3921 = vmatprep.subr.bf16.mxu1 %v4648_v46 }
 0x1e1   : > { %v3894_v37 = vpop.f32.mrb[82].mxu0 }
 0x1e2   : > { %v2101_v39 = vpack.c.bf16 %v3894_v37, %v3893_v33  ;;  %v2040_v41 = vpop.f32.mrb[83].mxu0 }
 0x1e3   : > { %v2100_v4 = vpack.c.bf16 %v2040_v41, %v2037_v35  ;;  %3922 = vmatpush3.bf16.msra.mxu1 %v4648_v46 }
 0x1e4   : > { %3971 = vmatprep.subr.bf16.mxu1 %v4585_v32 }
 0x1e5   : > { %3923 = vmatprep.mubr.bf16.mxu1 %v2100_v4 }
 0x1e6   : > { %3924 = vmatmul.mubr.bf16.vlgmr.msra.gmra.mrb[80].mxu1 %v2101_v39 }
 0x1e7   : > { %v3897_v43 = vpop.f32.mrb[84].mxu0  ;;  %3972 = vmatpush3.bf16.msra.mxu1 %v4585_v32 }
 0x1e8   : > { %v2053_v45 = vpop.f32.mrb[85].mxu0  ;;  %3973 = vmatprep.subr.bf16.mxu1 %v4594_v34 }
 0x1e9   : > { %v3898_v47 = vpop.f32.mrb[86].mxu0 }
 0x1ea   : > { %v2103_v48 = vpack.c.bf16 %v3898_v47, %v3897_v43  ;;  %v2056_v10 = vpop.f32.mrb[87].mxu0 }
 0x1eb   : > { %v2102_v11 = vpack.c.bf16 %v2056_v10, %v2053_v45  ;;  %3974 = vmatpush3.bf16.msra.mxu1 %v4594_v34 }
 0x1ec   : > { %3975 = vmatprep.subr.bf16.mxu1 %v4603_v36 }
 0x1ed   : > { %3927 = vmatprep.mubr.bf16.mxu1 %v2102_v11 }
 0x1ee   : > { %3928 = vmatmul.mubr.bf16.gmra.mrb[84].mxu1 %v2103_v48  ;;  %v4193_v48 = vld [vmem:[%s4466_s30 + $0x38] sm:$0xff]  }
 0x1ef   : > { %v3901_v49 = vpop.f32.mrb[88].mxu0  ;;  %3976 = vmatpush3.bf16.msra.mxu1 %v4603_v36 }
 0x1f0   : > { %v2069_v50 = vpop.f32.mrb[89].mxu0  ;;  %3977 = vmatprep.subr.bf16.mxu1 %v4612_v38 }
 0x1f1   : > { %v3902_v51 = vpop.f32.mrb[90].mxu0 }
 0x1f2   : > { %v2105_v52 = vpack.c.bf16 %v3902_v51, %v3901_v49  ;;  %v2072_v14 = vpop.f32.mrb[91].mxu0 }
 0x1f3   : > { %v2104_v15 = vpack.c.bf16 %v2072_v14, %v2069_v50  ;;  %3978 = vmatpush3.bf16.msra.mxu1 %v4612_v38 }
 0x1f4   : > { %3979 = vmatprep.subr.bf16.mxu1 %v4621_v40 }
 0x1f5   : > { %3931 = vmatprep.mubr.bf16.mxu1 %v2104_v15 }
 0x1f6   : > { %3932 = vmatmul.mubr.bf16.gmra.mrb[88].mxu1 %v2105_v52 }
 0x1f7   : > { %v3905_v53 = vpop.f32.mrb[92].mxu0  ;;  %3980 = vmatpush3.bf16.msra.mxu1 %v4621_v40 }
 0x1f8   : > { %v2085_v54 = vpop.f32.mrb[93].mxu0  ;;  %3981 = vmatprep.subr.bf16.mxu1 %v4630_v42 }
 0x1f9   : > { %v3906_v55 = vpop.f32.mrb[94].mxu0 }
 0x1fa   : > { %v2107_v56 = vpack.c.bf16 %v3906_v55, %v3905_v53  ;;  %v2088_v18 = vpop.f32.mrb[95].mxu0 }
 0x1fb   : > { %v2106_v19 = vpack.c.bf16 %v2088_v18, %v2085_v54  ;;  %3982 = vmatpush3.bf16.msra.mxu1 %v4630_v42 }
 0x1fc   : > { %3983 = vmatprep.subr.bf16.mxu1 %v4639_v44 }
 0x1fd   : > { %3935 = vmatprep.mubr.bf16.mxu1 %v2106_v19 }
 0x1fe   : > { %3936 = vmatmul.mubr.bf16.gmra.mrb[92].mxu1 %v2107_v56 }
 0x1ff   : > { %v3957_v57 = vpop.f32.mrb[96].mxu0  ;;  %3984 = vmatpush3.bf16.msra.mxu1 %v4639_v44 }
 0x200   : > { %v2353_v58 = vpop.f32.mrb[97].mxu0  ;;  %3985 = vmatprep.subr.bf16.mxu1 %v4648_v46 }
 0x201   : > { %v3958_v59 = vpop.f32.mrb[98].mxu0 }
 0x202   : > { %v2417_v60 = vpack.c.bf16 %v3958_v59, %v3957_v57  ;;  %v2356_v22 = vpop.f32.mrb[99].mxu0 }
 0x203   : > { %v2416_v61 = vpack.c.bf16 %v2356_v22, %v2353_v58  ;;  %3986 = vmatpush3.bf16.msra.mxu1 %v4648_v46 }
 0x204   : > { %4035 = vmatprep.subr.bf16.mxu1 %v4585_v32 }
 0x205   : > { %3987 = vmatprep.mubr.bf16.mxu1 %v2416_v61 }
 0x206   : > { %3988 = vmatmul.mubr.bf16.vlgmr.msra.gmra.mrb[96].mxu1 %v2417_v60 }
 0x207   : > { %v3961_v62 = vpop.f32.mrb[100].mxu0  ;;  %4036 = vmatpush3.bf16.msra.mxu1 %v4585_v32 }
 0x208   : > { %v2369_v63 = vpop.f32.mrb[101].mxu0  ;;  %4037 = vmatprep.subr.bf16.mxu1 %v4594_v34 }
 0x209   : > { %v3962_v0 = vpop.f32.mrb[102].mxu0 }
 0x20a   : > { %v2419_v1 = vpack.c.bf16 %v3962_v0, %v3961_v62  ;;  %v2372_v2 = vpop.f32.mrb[103].mxu0 }
 0x20b   : > { %v2418_v3 = vpack.c.bf16 %v2372_v2, %v2369_v63  ;;  %4038 = vmatpush3.bf16.msra.mxu1 %v4594_v34 }
 0x20c   : > { %4039 = vmatprep.subr.bf16.mxu1 %v4603_v36 }
 0x20d   : > { %3991 = vmatprep.mubr.bf16.mxu1 %v2418_v3 }
 0x20e   : > { %3992 = vmatmul.mubr.bf16.gmra.mrb[100].mxu1 %v2419_v1 }
 0x20f   : > { %v3965_v5 = vpop.f32.mrb[104].mxu0  ;;  %4040 = vmatpush3.bf16.msra.mxu1 %v4603_v36 }
 0x210   : > { %v2385_v6 = vpop.f32.mrb[105].mxu0  ;;  %4041 = vmatprep.subr.bf16.mxu1 %v4612_v38 }
 0x211   : > { %v3966_v32 = vpop.f32.mrb[106].mxu0 }
 0x212   : > { %v2421_v7 = vpack.c.bf16 %v3966_v32, %v3965_v5  ;;  %v2388_v8 = vpop.f32.mrb[107].mxu0 }
 0x213   : > { %v2420_v9 = vpack.c.bf16 %v2388_v8, %v2385_v6  ;;  %4042 = vmatpush3.bf16.msra.mxu1 %v4612_v38 }
 0x214   : > { %4043 = vmatprep.subr.bf16.mxu1 %v4621_v40 }
 0x215   : > { %3995 = vmatprep.mubr.bf16.mxu1 %v2420_v9 }
 0x216   : > { %3996 = vmatmul.mubr.bf16.gmra.mrb[104].mxu1 %v2421_v7 }
 0x217   : > { %v3969_v34 = vpop.f32.mrb[108].mxu0  ;;  %4044 = vmatpush3.bf16.msra.mxu1 %v4621_v40 }
 0x218   : > { %v2401_v12 = vpop.f32.mrb[109].mxu0  ;;  %4045 = vmatprep.subr.bf16.mxu1 %v4630_v42 }
 0x219   : > { %v3605_v36 = vpop.f32.mrb[0].mxu1  ;;  %v3970_v13 = vpop.f32.mrb[110].mxu0 }
 0x21a   : > { %v628_v16 = vmax.f32 %v3605_v36, 0.0  ;;  %v2423_v17 = vpack.c.bf16 %v3970_v13, %v3969_v34  ;;  %v563_v20 = vpop.f32.mrb[1].mxu1  ;;  %v2404_v21 = vpop.f32.mrb[111].mxu0 }
 0x21b   : > { %v626_v38 = vmax.f32 %v563_v20, 0.0  ;;  %v2422_v23 = vpack.c.bf16 %v2404_v21, %v2401_v12  ;;  %v3606_v40 = vpop.f32.mrb[2].mxu1  ;;  %4046 = vmatpush3.bf16.msra.mxu1 %v4630_v42 }
 0x21c   : > { %v644_v24 = vmin.f32 %v628_v16, 1.0  ;;  %v629_v25 = vmax.f32 %v3606_v40, 0.0  ;;  %v566_v26 = vpop.f32.mrb[3].mxu1  ;;  %4047 = vmatprep.subr.bf16.mxu1 %v4639_v44 }
 0x21d   : > { %v642_v27 = vmin.f32 %v626_v38, 1.0  ;;  %v627_v28 = vmax.f32 %v566_v26, 0.0  ;;  %3999 = vmatprep.mubr.bf16.mxu1 %v2422_v23 }
 0x21e   : > { %660 = vst [vmem:[%s4904_s15 + $0x10] sm:$0xff] %v644_v24  ;;  %v645_v29 = vmin.f32 %v629_v25, 1.0  ;;  %4000 = vmatmul.mubr.bf16.gmra.mrb[108].mxu1 %v2423_v17 }
 0x21f   : > { %658 = vst [vmem:[%s4904_s15] sm:$0xff] %v642_v27  ;;  %v643_v30 = vmin.f32 %v627_v28, 1.0  ;;  %v4021_v31 = vpop.f32.mrb[112].mxu0  ;;  %4048 = vmatpush3.bf16.msra.mxu1 %v4639_v44 }
 0x220   : > { %661 = vst [vmem:[%s4904_s15 + $0x18] sm:$0xff] %v645_v29  ;;  %v2669_v42 = vpop.f32.mrb[113].mxu0  ;;  %4049 = vmatprep.subr.bf16.mxu1 %v4648_v46 }
 0x221   : > { %659 = vst [vmem:[%s4904_s15 + $0x8] sm:$0xff] %v643_v30  ;;  %v3609_v33 = vpop.f32.mrb[4].mxu1  ;;  %v4022_v35 = vpop.f32.mrb[114].mxu0 }
 0x222   : > { %v632_v37 = vmax.f32 %v3609_v33, 0.0  ;;  %v2733_v39 = vpack.c.bf16 %v4022_v35, %v4021_v31  ;;  %v579_v41 = vpop.f32.mrb[5].mxu1  ;;  %v2672_v4 = vpop.f32.mrb[115].mxu0 }
 0x223   : > { %v630_v43 = vmax.f32 %v579_v41, 0.0  ;;  %v2732_v45 = vpack.c.bf16 %v2672_v4, %v2669_v42  ;;  %v3610_v47 = vpop.f32.mrb[6].mxu1  ;;  %4050 = vmatpush3.bf16.msra.mxu1 %v4193_v48 }
 0x224   : > { %v648_v44 = vmin.f32 %v632_v37, 1.0  ;;  %v633_v10 = vmax.f32 %v3610_v47, 0.0  ;;  %v582_v11 = vpop.f32.mrb[7].mxu1 }
 0x225   : > { %v646_v46 = vmin.f32 %v630_v43, 1.0  ;;  %v631_v49 = vmax.f32 %v582_v11, 0.0  ;;  %4051 = vmatprep.mubr.bf16.mxu1 %v2732_v45 }
 0x226   : > { %664 = vst [vmem:[%s4904_s15 + $0x30] sm:$0xff] %v648_v44  ;;  %v649_v50 = vmin.f32 %v633_v10, 1.0  ;;  %4052 = vmatmul.mubr.bf16.vlgmr.msra.gmra.mrb[112].mxu1 %v2733_v39 }
 0x227   : > { %662 = vst [vmem:[%s4904_s15 + $0x20] sm:$0xff] %v646_v46  ;;  %v647_v51 = vmin.f32 %v631_v49, 1.0  ;;  %v4025_v52 = vpop.f32.mrb[116].mxu0 }
 0x228   : > { %665 = vst [vmem:[%s4904_s15 + $0x38] sm:$0xff] %v649_v50  ;;  %v2685_v14 = vpop.f32.mrb[117].mxu0 }
 0x229   : > { %663 = vst [vmem:[%s4904_s15 + $0x28] sm:$0xff] %v647_v51  ;;  %v3613_v15 = vpop.f32.mrb[8].mxu1  ;;  %v4026_v53 = vpop.f32.mrb[118].mxu0 }
 0x22a   : > { %v636_v54 = vmax.f32 %v3613_v15, 0.0  ;;  %v2735_v55 = vpack.c.bf16 %v4026_v53, %v4025_v52  ;;  %v595_v56 = vpop.f32.mrb[9].mxu1  ;;  %v2688_v18 = vpop.f32.mrb[119].mxu0 }
 0x22b   : > { %v634_v19 = vmax.f32 %v595_v56, 0.0  ;;  %v2734_v57 = vpack.c.bf16 %v2688_v18, %v2685_v14  ;;  %v3614_v58 = vpop.f32.mrb[10].mxu1 }
 0x22c   : > { %v652_v59 = vmin.f32 %v636_v54, 1.0  ;;  %v637_v60 = vmax.f32 %v3614_v58, 0.0  ;;  %v598_v22 = vpop.f32.mrb[11].mxu1 }
 0x22d   : > { %v650_v61 = vmin.f32 %v634_v19, 1.0  ;;  %v635_v62 = vmax.f32 %v598_v22, 0.0  ;;  %4055 = vmatprep.mubr.bf16.mxu1 %v2734_v57 }
 0x22e   : > { %668 = vst [vmem:[%s4904_s15 + $0x50] sm:$0xff] %v652_v59  ;;  %v653_v63 = vmin.f32 %v637_v60, 1.0  ;;  %4056 = vmatmul.mubr.bf16.gmra.mrb[116].mxu1 %v2735_v55 }
 0x22f   : > { %666 = vst [vmem:[%s4904_s15 + $0x40] sm:$0xff] %v650_v61  ;;  %v651_v0 = vmin.f32 %v635_v62, 1.0  ;;  %v4029_v1 = vpop.f32.mrb[120].mxu0 }
 0x230   : > { %669 = vst [vmem:[%s4904_s15 + $0x58] sm:$0xff] %v653_v63  ;;  %v2701_v2 = vpop.f32.mrb[121].mxu0 }
 0x231   : > { %667 = vst [vmem:[%s4904_s15 + $0x48] sm:$0xff] %v651_v0  ;;  %v3617_v3 = vpop.f32.mrb[12].mxu1  ;;  %v4030_v5 = vpop.f32.mrb[122].mxu0 }
 0x232   : > { %v640_v6 = vmax.f32 %v3617_v3, 0.0  ;;  %v2737_v32 = vpack.c.bf16 %v4030_v5, %v4029_v1  ;;  %v611_v7 = vpop.f32.mrb[13].mxu1  ;;  %v2704_v8 = vpop.f32.mrb[123].mxu0 }
 0x233   : > { %v638_v9 = vmax.f32 %v611_v7, 0.0  ;;  %v2736_v34 = vpack.c.bf16 %v2704_v8, %v2701_v2  ;;  %v3618_v12 = vpop.f32.mrb[14].mxu1 }
 0x234   : > { %v656_v36 = vmin.f32 %v640_v6, 1.0  ;;  %v641_v13 = vmax.f32 %v3618_v12, 0.0  ;;  %v614_v16 = vpop.f32.mrb[15].mxu1 }
 0x235   : > { %v654_v17 = vmin.f32 %v638_v9, 1.0  ;;  %v639_v20 = vmax.f32 %v614_v16, 0.0  ;;  %4059 = vmatprep.mubr.bf16.mxu1 %v2736_v34 }
 0x236   : > { %672 = vst [vmem:[%s4904_s15 + $0x70] sm:$0xff] %v656_v36  ;;  %v657_v21 = vmin.f32 %v641_v13, 1.0  ;;  %4060 = vmatmul.mubr.bf16.gmra.mrb[120].mxu1 %v2737_v32 }
 0x237   : > { %670 = vst [vmem:[%s4904_s15 + $0x60] sm:$0xff] %v654_v17  ;;  %v655_v38 = vmin.f32 %v639_v20, 1.0  ;;  %v4033_v23 = vpop.f32.mrb[124].mxu0 }
 0x238   : > { %673 = vst [vmem:[%s4904_s15 + $0x78] sm:$0xff] %v657_v21  ;;  %v2717_v40 = vpop.f32.mrb[125].mxu0 }
 0x239   : > { %671 = vst [vmem:[%s4904_s15 + $0x68] sm:$0xff] %v655_v38  ;;  %v3669_v24 = vpop.f32.mrb[16].mxu1  ;;  %v4034_v25 = vpop.f32.mrb[126].mxu0 }
 0x23a   : > { %v943_v26 = vmax.f32 %v3669_v24, 0.0  ;;  %v2739_v27 = vpack.c.bf16 %v4034_v25, %v4033_v23  ;;  %v878_v28 = vpop.f32.mrb[17].mxu1  ;;  %v2720_v29 = vpop.f32.mrb[127].mxu0 }
 0x23b   : > { %v941_v30 = vmax.f32 %v878_v28, 0.0  ;;  %v2738_v31 = vpack.c.bf16 %v2720_v29, %v2717_v40  ;;  %v3670_v42 = vpop.f32.mrb[18].mxu1 }
 0x23c   : > { %v959_v33 = vmin.f32 %v943_v26, 1.0  ;;  %v944_v35 = vmax.f32 %v3670_v42, 0.0  ;;  %v881_v37 = vpop.f32.mrb[19].mxu1 }
 0x23d   : > { %v957_v39 = vmin.f32 %v941_v30, 1.0  ;;  %v942_v41 = vmax.f32 %v881_v37, 0.0  ;;  %4063 = vmatprep.mubr.bf16.mxu1 %v2738_v31 }
 0x23e   : > { %3040 = vst [vmem:[%s4904_s15 + $0x90] sm:$0xff] %v959_v33  ;;  %v960_v4 = vmin.f32 %v944_v35, 1.0  ;;  %4064 = vmatmul.mubr.bf16.gmra.mrb[124].mxu1 %v2739_v27 }
 0x23f   : > { %3038 = vst [vmem:[%s4904_s15 + $0x80] sm:$0xff] %v957_v39  ;;  %v958_v43 = vmin.f32 %v942_v41, 1.0 }
 0x240   : > { %3041 = vst [vmem:[%s4904_s15 + $0x98] sm:$0xff] %v960_v4 }
 0x241   : > { %3039 = vst [vmem:[%s4904_s15 + $0x88] sm:$0xff] %v958_v43  ;;  %v3673_v45 = vpop.f32.mrb[20].mxu1 }
 0x242   : > { %v947_v47 = vmax.f32 %v3673_v45, 0.0  ;;  %v894_v48 = vpop.f32.mrb[21].mxu1 }
 0x243   : > { %v945_v44 = vmax.f32 %v894_v48, 0.0  ;;  %v3674_v10 = vpop.f32.mrb[22].mxu1 }
 0x244   : > { %v963_v11 = vmin.f32 %v947_v47, 1.0  ;;  %v948_v46 = vmax.f32 %v3674_v10, 0.0  ;;  %v897_v49 = vpop.f32.mrb[23].mxu1 }
 0x245   : > { %v961_v50 = vmin.f32 %v945_v44, 1.0  ;;  %v946_v51 = vmax.f32 %v897_v49, 0.0 }
 0x246   : > { %3044 = vst [vmem:[%s4904_s15 + $0xb0] sm:$0xff] %v963_v11  ;;  %v964_v52 = vmin.f32 %v948_v46, 1.0 }
 0x247   : > { %3042 = vst [vmem:[%s4904_s15 + $0xa0] sm:$0xff] %v961_v50  ;;  %v962_v14 = vmin.f32 %v946_v51, 1.0 }
 0x248   : > { %3045 = vst [vmem:[%s4904_s15 + $0xb8] sm:$0xff] %v964_v52 }
 0x249   : > { %3043 = vst [vmem:[%s4904_s15 + $0xa8] sm:$0xff] %v962_v14  ;;  %v3677_v15 = vpop.f32.mrb[24].mxu1 }
 0x24a   : > { %v951_v53 = vmax.f32 %v3677_v15, 0.0  ;;  %v910_v54 = vpop.f32.mrb[25].mxu1 }
 0x24b   : > { %v949_v55 = vmax.f32 %v910_v54, 0.0  ;;  %v3678_v56 = vpop.f32.mrb[26].mxu1 }
 0x24c   : > { %v967_v18 = vmin.f32 %v951_v53, 1.0  ;;  %v952_v19 = vmax.f32 %v3678_v56, 0.0  ;;  %v913_v57 = vpop.f32.mrb[27].mxu1 }
 0x24d   : > { %v965_v58 = vmin.f32 %v949_v55, 1.0  ;;  %v950_v59 = vmax.f32 %v913_v57, 0.0 }
 0x24e   : > { %3048 = vst [vmem:[%s4904_s15 + $0xd0] sm:$0xff] %v967_v18  ;;  %v968_v60 = vmin.f32 %v952_v19, 1.0 }
 0x24f   : > { %3046 = vst [vmem:[%s4904_s15 + $0xc0] sm:$0xff] %v965_v58  ;;  %v966_v22 = vmin.f32 %v950_v59, 1.0 }
 0x250   : > { %3049 = vst [vmem:[%s4904_s15 + $0xd8] sm:$0xff] %v968_v60 }
 0x251   : > { %3047 = vst [vmem:[%s4904_s15 + $0xc8] sm:$0xff] %v966_v22  ;;  %v3681_v61 = vpop.f32.mrb[28].mxu1 }
 0x252   : > { %v955_v62 = vmax.f32 %v3681_v61, 0.0  ;;  %v926_v63 = vpop.f32.mrb[29].mxu1 }
 0x253   : > { %v953_v0 = vmax.f32 %v926_v63, 0.0  ;;  %v3682_v1 = vpop.f32.mrb[30].mxu1 }
 0x254   : > { %v971_v2 = vmin.f32 %v955_v62, 1.0  ;;  %v956_v3 = vmax.f32 %v3682_v1, 0.0  ;;  %v929_v5 = vpop.f32.mrb[31].mxu1 }
 0x255   : > { %v969_v6 = vmin.f32 %v953_v0, 1.0  ;;  %v954_v32 = vmax.f32 %v929_v5, 0.0 }
 0x256   : > { %3052 = vst [vmem:[%s4904_s15 + $0xf0] sm:$0xff] %v971_v2  ;;  %v972_v7 = vmin.f32 %v956_v3, 1.0 }
 0x257   : > { %3050 = vst [vmem:[%s4904_s15 + $0xe0] sm:$0xff] %v969_v6  ;;  %v970_v8 = vmin.f32 %v954_v32, 1.0 }
 0x258   : > { %3053 = vst [vmem:[%s4904_s15 + $0xf8] sm:$0xff] %v972_v7 }
 0x259   : > { %3051 = vst [vmem:[%s4904_s15 + $0xe8] sm:$0xff] %v970_v8  ;;  %v3733_v9 = vpop.f32.mrb[32].mxu1 }
 0x25a   : > { %v1259_v34 = vmax.f32 %v3733_v9, 0.0  ;;  %v1194_v12 = vpop.f32.mrb[33].mxu1 }
 0x25b   : > { %v1257_v36 = vmax.f32 %v1194_v12, 0.0  ;;  %v3734_v13 = vpop.f32.mrb[34].mxu1 }
 0x25c   : > { %v1275_v16 = vmin.f32 %v1259_v34, 1.0  ;;  %v1260_v17 = vmax.f32 %v3734_v13, 0.0  ;;  %v1197_v20 = vpop.f32.mrb[35].mxu1 }
 0x25d   : > { %v1273_v21 = vmin.f32 %v1257_v36, 1.0  ;;  %v1258_v38 = vmax.f32 %v1197_v20, 0.0 }
 0x25e   : > { %3080 = vst [vmem:[%s4904_s15 + $0x110] sm:$0xff] %v1275_v16  ;;  %v1276_v23 = vmin.f32 %v1260_v17, 1.0 }
 0x25f   : > { %3078 = vst [vmem:[%s4904_s15 + $0x100] sm:$0xff] %v1273_v21  ;;  %v1274_v40 = vmin.f32 %v1258_v38, 1.0 }
 0x260   : > { %3081 = vst [vmem:[%s4904_s15 + $0x118] sm:$0xff] %v1276_v23 }
 0x261   : > { %3079 = vst [vmem:[%s4904_s15 + $0x108] sm:$0xff] %v1274_v40  ;;  %v3737_v24 = vpop.f32.mrb[36].mxu1 }
 0x262   : > { %v1263_v25 = vmax.f32 %v3737_v24, 0.0  ;;  %v1210_v26 = vpop.f32.mrb[37].mxu1 }
 0x263   : > { %v1261_v27 = vmax.f32 %v1210_v26, 0.0  ;;  %v3738_v28 = vpop.f32.mrb[38].mxu1 }
 0x264   : > { %v1279_v29 = vmin.f32 %v1263_v25, 1.0  ;;  %v1264_v30 = vmax.f32 %v3738_v28, 0.0  ;;  %v1213_v31 = vpop.f32.mrb[39].mxu1 }
 0x265   : > { %v1277_v42 = vmin.f32 %v1261_v27, 1.0  ;;  %v1262_v33 = vmax.f32 %v1213_v31, 0.0 }
 0x266   : > { %3084 = vst [vmem:[%s4904_s15 + $0x130] sm:$0xff] %v1279_v29  ;;  %v1280_v35 = vmin.f32 %v1264_v30, 1.0 }
 0x267   : > { %3082 = vst [vmem:[%s4904_s15 + $0x120] sm:$0xff] %v1277_v42  ;;  %v1278_v37 = vmin.f32 %v1262_v33, 1.0 }
 0x268   : > { %3085 = vst [vmem:[%s4904_s15 + $0x138] sm:$0xff] %v1280_v35 }
 0x269   : > { %3083 = vst [vmem:[%s4904_s15 + $0x128] sm:$0xff] %v1278_v37  ;;  %v3741_v39 = vpop.f32.mrb[40].mxu1 }
 0x26a   : > { %v1267_v41 = vmax.f32 %v3741_v39, 0.0  ;;  %v1226_v4 = vpop.f32.mrb[41].mxu1 }
 0x26b   : > { %v1265_v43 = vmax.f32 %v1226_v4, 0.0  ;;  %v3742_v45 = vpop.f32.mrb[42].mxu1 }
 0x26c   : > { %v1283_v47 = vmin.f32 %v1267_v41, 1.0  ;;  %v1268_v48 = vmax.f32 %v3742_v45, 0.0  ;;  %v1229_v44 = vpop.f32.mrb[43].mxu1 }
 0x26d   : > { %v1281_v10 = vmin.f32 %v1265_v43, 1.0  ;;  %v1266_v11 = vmax.f32 %v1229_v44, 0.0 }
 0x26e   : > { %3088 = vst [vmem:[%s4904_s15 + $0x150] sm:$0xff] %v1283_v47  ;;  %v1284_v46 = vmin.f32 %v1268_v48, 1.0 }
 0x26f   : > { %3086 = vst [vmem:[%s4904_s15 + $0x140] sm:$0xff] %v1281_v10  ;;  %v1282_v49 = vmin.f32 %v1266_v11, 1.0 }
 0x270   : > { %3089 = vst [vmem:[%s4904_s15 + $0x158] sm:$0xff] %v1284_v46 }
 0x271   : > { %3087 = vst [vmem:[%s4904_s15 + $0x148] sm:$0xff] %v1282_v49  ;;  %v3745_v50 = vpop.f32.mrb[44].mxu1 }
 0x272   : > { %v1271_v51 = vmax.f32 %v3745_v50, 0.0  ;;  %v1242_v52 = vpop.f32.mrb[45].mxu1 }
 0x273   : > { %v1269_v14 = vmax.f32 %v1242_v52, 0.0  ;;  %v3746_v15 = vpop.f32.mrb[46].mxu1 }
 0x274   : > { %v1287_v53 = vmin.f32 %v1271_v51, 1.0  ;;  %v1272_v54 = vmax.f32 %v3746_v15, 0.0  ;;  %v1245_v55 = vpop.f32.mrb[47].mxu1 }
 0x275   : > { %v1285_v56 = vmin.f32 %v1269_v14, 1.0  ;;  %v1270_v18 = vmax.f32 %v1245_v55, 0.0 }
 0x276   : > { %3092 = vst [vmem:[%s4904_s15 + $0x170] sm:$0xff] %v1287_v53  ;;  %v1288_v19 = vmin.f32 %v1272_v54, 1.0 }
 0x277   : > { %3090 = vst [vmem:[%s4904_s15 + $0x160] sm:$0xff] %v1285_v56  ;;  %v1286_v57 = vmin.f32 %v1270_v18, 1.0 }
 0x278   : > { %3093 = vst [vmem:[%s4904_s15 + $0x178] sm:$0xff] %v1288_v19 }
 0x279   : > { %3091 = vst [vmem:[%s4904_s15 + $0x168] sm:$0xff] %v1286_v57  ;;  %v3797_v58 = vpop.f32.mrb[48].mxu1 }
 0x27a   : > { %v1575_v59 = vmax.f32 %v3797_v58, 0.0  ;;  %v1510_v60 = vpop.f32.mrb[49].mxu1 }
 0x27b   : > { %v1573_v22 = vmax.f32 %v1510_v60, 0.0  ;;  %v3798_v61 = vpop.f32.mrb[50].mxu1 }
 0x27c   : > { %v1591_v62 = vmin.f32 %v1575_v59, 1.0  ;;  %v1576_v63 = vmax.f32 %v3798_v61, 0.0  ;;  %v1513_v0 = vpop.f32.mrb[51].mxu1 }
 0x27d   : > { %v1589_v1 = vmin.f32 %v1573_v22, 1.0  ;;  %v1574_v2 = vmax.f32 %v1513_v0, 0.0 }
 0x27e   : > { %3120 = vst [vmem:[%s4904_s15 + $0x190] sm:$0xff] %v1591_v62  ;;  %v1592_v3 = vmin.f32 %v1576_v63, 1.0 }
 0x27f   : > { %3118 = vst [vmem:[%s4904_s15 + $0x180] sm:$0xff] %v1589_v1  ;;  %v1590_v5 = vmin.f32 %v1574_v2, 1.0 }
 0x280   : > { %3121 = vst [vmem:[%s4904_s15 + $0x198] sm:$0xff] %v1592_v3 }
 0x281   : > { %3119 = vst [vmem:[%s4904_s15 + $0x188] sm:$0xff] %v1590_v5  ;;  %v3801_v6 = vpop.f32.mrb[52].mxu1 }
 0x282   : > { %v1579_v32 = vmax.f32 %v3801_v6, 0.0  ;;  %v1526_v7 = vpop.f32.mrb[53].mxu1 }
 0x283   : > { %v1577_v8 = vmax.f32 %v1526_v7, 0.0  ;;  %v3802_v9 = vpop.f32.mrb[54].mxu1 }
 0x284   : > { %v1595_v34 = vmin.f32 %v1579_v32, 1.0  ;;  %v1580_v12 = vmax.f32 %v3802_v9, 0.0  ;;  %v1529_v36 = vpop.f32.mrb[55].mxu1 }
 0x285   : > { %v1593_v13 = vmin.f32 %v1577_v8, 1.0  ;;  %v1578_v16 = vmax.f32 %v1529_v36, 0.0 }
 0x286   : > { %3124 = vst [vmem:[%s4904_s15 + $0x1b0] sm:$0xff] %v1595_v34  ;;  %v1596_v17 = vmin.f32 %v1580_v12, 1.0 }
 0x287   : > { %3122 = vst [vmem:[%s4904_s15 + $0x1a0] sm:$0xff] %v1593_v13  ;;  %v1594_v20 = vmin.f32 %v1578_v16, 1.0 }
 0x288   : > { %3125 = vst [vmem:[%s4904_s15 + $0x1b8] sm:$0xff] %v1596_v17 }
 0x289   : > { %3123 = vst [vmem:[%s4904_s15 + $0x1a8] sm:$0xff] %v1594_v20  ;;  %v3805_v21 = vpop.f32.mrb[56].mxu1 }
 0x28a   : > { %v1583_v38 = vmax.f32 %v3805_v21, 0.0  ;;  %v1542_v23 = vpop.f32.mrb[57].mxu1 }
 0x28b   : > { %v1581_v40 = vmax.f32 %v1542_v23, 0.0  ;;  %v3806_v24 = vpop.f32.mrb[58].mxu1 }
 0x28c   : > { %v1599_v25 = vmin.f32 %v1583_v38, 1.0  ;;  %v1584_v26 = vmax.f32 %v3806_v24, 0.0  ;;  %v1545_v27 = vpop.f32.mrb[59].mxu1 }
 0x28d   : > { %v1597_v28 = vmin.f32 %v1581_v40, 1.0  ;;  %v1582_v29 = vmax.f32 %v1545_v27, 0.0 }
 0x28e   : > { %3128 = vst [vmem:[%s4904_s15 + $0x1d0] sm:$0xff] %v1599_v25  ;;  %v1600_v30 = vmin.f32 %v1584_v26, 1.0 }
 0x28f   : > { %3126 = vst [vmem:[%s4904_s15 + $0x1c0] sm:$0xff] %v1597_v28  ;;  %v1598_v31 = vmin.f32 %v1582_v29, 1.0 }
 0x290   : > { %3129 = vst [vmem:[%s4904_s15 + $0x1d8] sm:$0xff] %v1600_v30 }
 0x291   : > { %3127 = vst [vmem:[%s4904_s15 + $0x1c8] sm:$0xff] %v1598_v31  ;;  %v3809_v42 = vpop.f32.mrb[60].mxu1 }
 0x292   : > { %v1587_v33 = vmax.f32 %v3809_v42, 0.0  ;;  %v1558_v35 = vpop.f32.mrb[61].mxu1 }
 0x293   : > { %v1585_v37 = vmax.f32 %v1558_v35, 0.0  ;;  %v3810_v39 = vpop.f32.mrb[62].mxu1 }
 0x294   : > { %v1603_v41 = vmin.f32 %v1587_v33, 1.0  ;;  %v1588_v4 = vmax.f32 %v3810_v39, 0.0  ;;  %v1561_v43 = vpop.f32.mrb[63].mxu1 }
 0x295   : > { %v1601_v45 = vmin.f32 %v1585_v37, 1.0  ;;  %v1586_v47 = vmax.f32 %v1561_v43, 0.0 }
 0x296   : > { %3132 = vst [vmem:[%s4904_s15 + $0x1f0] sm:$0xff] %v1603_v41  ;;  %v1604_v48 = vmin.f32 %v1588_v4, 1.0 }
 0x297   : > { %3130 = vst [vmem:[%s4904_s15 + $0x1e0] sm:$0xff] %v1601_v45  ;;  %v1602_v44 = vmin.f32 %v1586_v47, 1.0 }
 0x298   : > { %3133 = vst [vmem:[%s4904_s15 + $0x1f8] sm:$0xff] %v1604_v48 }
 0x299   : > { %3131 = vst [vmem:[%s4904_s15 + $0x1e8] sm:$0xff] %v1602_v44  ;;  %v3861_v10 = vpop.f32.mrb[64].mxu1 }
 0x29a   : > { %v1891_v11 = vmax.f32 %v3861_v10, 0.0  ;;  %v1826_v46 = vpop.f32.mrb[65].mxu1 }
 0x29b   : > { %v1889_v49 = vmax.f32 %v1826_v46, 0.0  ;;  %v3862_v50 = vpop.f32.mrb[66].mxu1 }
 0x29c   : > { %v1907_v51 = vmin.f32 %v1891_v11, 1.0  ;;  %v1892_v52 = vmax.f32 %v3862_v50, 0.0  ;;  %v1829_v14 = vpop.f32.mrb[67].mxu1 }
 0x29d   : > { %v1905_v15 = vmin.f32 %v1889_v49, 1.0  ;;  %v1890_v53 = vmax.f32 %v1829_v14, 0.0 }
 0x29e   : > { %3160 = vst [vmem:[%s4904_s15 + $0x210] sm:$0xff] %v1907_v51  ;;  %v1908_v54 = vmin.f32 %v1892_v52, 1.0 }
 0x29f   : > { %3158 = vst [vmem:[%s4904_s15 + $0x200] sm:$0xff] %v1905_v15  ;;  %v1906_v55 = vmin.f32 %v1890_v53, 1.0 }
 0x2a0   : > { %3161 = vst [vmem:[%s4904_s15 + $0x218] sm:$0xff] %v1908_v54 }
 0x2a1   : > { %3159 = vst [vmem:[%s4904_s15 + $0x208] sm:$0xff] %v1906_v55  ;;  %v3865_v56 = vpop.f32.mrb[68].mxu1 }
 0x2a2   : > { %v1895_v18 = vmax.f32 %v3865_v56, 0.0  ;;  %v1842_v19 = vpop.f32.mrb[69].mxu1 }
 0x2a3   : > { %v1893_v57 = vmax.f32 %v1842_v19, 0.0  ;;  %v3866_v58 = vpop.f32.mrb[70].mxu1 }
 0x2a4   : > { %v1911_v59 = vmin.f32 %v1895_v18, 1.0  ;;  %v1896_v60 = vmax.f32 %v3866_v58, 0.0  ;;  %v1845_v22 = vpop.f32.mrb[71].mxu1 }
 0x2a5   : > { %v1909_v61 = vmin.f32 %v1893_v57, 1.0  ;;  %v1894_v62 = vmax.f32 %v1845_v22, 0.0 }
 0x2a6   : > { %3164 = vst [vmem:[%s4904_s15 + $0x230] sm:$0xff] %v1911_v59  ;;  %v1912_v63 = vmin.f32 %v1896_v60, 1.0 }
 0x2a7   : > { %3162 = vst [vmem:[%s4904_s15 + $0x220] sm:$0xff] %v1909_v61  ;;  %v1910_v0 = vmin.f32 %v1894_v62, 1.0 }
 0x2a8   : > { %3165 = vst [vmem:[%s4904_s15 + $0x238] sm:$0xff] %v1912_v63 }
 0x2a9   : > { %3163 = vst [vmem:[%s4904_s15 + $0x228] sm:$0xff] %v1910_v0  ;;  %v3869_v1 = vpop.f32.mrb[72].mxu1 }
 0x2aa   : > { %v1899_v2 = vmax.f32 %v3869_v1, 0.0  ;;  %v1858_v3 = vpop.f32.mrb[73].mxu1 }
 0x2ab   : > { %v1897_v5 = vmax.f32 %v1858_v3, 0.0  ;;  %v3870_v6 = vpop.f32.mrb[74].mxu1 }
 0x2ac   : > { %v1915_v32 = vmin.f32 %v1899_v2, 1.0  ;;  %v1900_v7 = vmax.f32 %v3870_v6, 0.0  ;;  %v1861_v8 = vpop.f32.mrb[75].mxu1 }
 0x2ad   : > { %v1913_v9 = vmin.f32 %v1897_v5, 1.0  ;;  %v1898_v34 = vmax.f32 %v1861_v8, 0.0 }
 0x2ae   : > { %3168 = vst [vmem:[%s4904_s15 + $0x250] sm:$0xff] %v1915_v32  ;;  %v1916_v12 = vmin.f32 %v1900_v7, 1.0 }
 0x2af   : > { %3166 = vst [vmem:[%s4904_s15 + $0x240] sm:$0xff] %v1913_v9  ;;  %v1914_v36 = vmin.f32 %v1898_v34, 1.0 }
 0x2b0   : > { %3169 = vst [vmem:[%s4904_s15 + $0x258] sm:$0xff] %v1916_v12 }
 0x2b1   : > { %3167 = vst [vmem:[%s4904_s15 + $0x248] sm:$0xff] %v1914_v36  ;;  %v3873_v13 = vpop.f32.mrb[76].mxu1 }
 0x2b2   : > { %v1903_v16 = vmax.f32 %v3873_v13, 0.0  ;;  %v1874_v17 = vpop.f32.mrb[77].mxu1 }
 0x2b3   : > { %v1901_v20 = vmax.f32 %v1874_v17, 0.0  ;;  %v3874_v21 = vpop.f32.mrb[78].mxu1 }
 0x2b4   : > { %v1919_v38 = vmin.f32 %v1903_v16, 1.0  ;;  %v1904_v23 = vmax.f32 %v3874_v21, 0.0  ;;  %v1877_v40 = vpop.f32.mrb[79].mxu1 }
 0x2b5   : > { %v1917_v24 = vmin.f32 %v1901_v20, 1.0  ;;  %v1902_v25 = vmax.f32 %v1877_v40, 0.0 }
 0x2b6   : > { %3172 = vst [vmem:[%s4904_s15 + $0x270] sm:$0xff] %v1919_v38  ;;  %v1920_v26 = vmin.f32 %v1904_v23, 1.0 }
 0x2b7   : > { %3170 = vst [vmem:[%s4904_s15 + $0x260] sm:$0xff] %v1917_v24  ;;  %v1918_v27 = vmin.f32 %v1902_v25, 1.0 }
 0x2b8   : > { %3173 = vst [vmem:[%s4904_s15 + $0x278] sm:$0xff] %v1920_v26 }
 0x2b9   : > { %3171 = vst [vmem:[%s4904_s15 + $0x268] sm:$0xff] %v1918_v27  ;;  %v3925_v28 = vpop.f32.mrb[80].mxu1 }
 0x2ba   : > { %v2207_v29 = vmax.f32 %v3925_v28, 0.0  ;;  %v2142_v30 = vpop.f32.mrb[81].mxu1 }
 0x2bb   : > { %v2205_v31 = vmax.f32 %v2142_v30, 0.0  ;;  %v3926_v42 = vpop.f32.mrb[82].mxu1 }
 0x2bc   : > { %v2223_v33 = vmin.f32 %v2207_v29, 1.0  ;;  %v2208_v35 = vmax.f32 %v3926_v42, 0.0  ;;  %v2145_v37 = vpop.f32.mrb[83].mxu1 }
 0x2bd   : > { %v2221_v39 = vmin.f32 %v2205_v31, 1.0  ;;  %v2206_v41 = vmax.f32 %v2145_v37, 0.0 }
 0x2be   : > { %3200 = vst [vmem:[%s4904_s15 + $0x290] sm:$0xff] %v2223_v33  ;;  %v2224_v4 = vmin.f32 %v2208_v35, 1.0 }
 0x2bf   : > { %3198 = vst [vmem:[%s4904_s15 + $0x280] sm:$0xff] %v2221_v39  ;;  %v2222_v43 = vmin.f32 %v2206_v41, 1.0 }
 0x2c0   : > { %3201 = vst [vmem:[%s4904_s15 + $0x298] sm:$0xff] %v2224_v4 }
 0x2c1   : > { %3199 = vst [vmem:[%s4904_s15 + $0x288] sm:$0xff] %v2222_v43  ;;  %v3929_v45 = vpop.f32.mrb[84].mxu1 }
 0x2c2   : > { %v2211_v47 = vmax.f32 %v3929_v45, 0.0  ;;  %v2158_v48 = vpop.f32.mrb[85].mxu1 }
 0x2c3   : > { %v2209_v44 = vmax.f32 %v2158_v48, 0.0  ;;  %v3930_v10 = vpop.f32.mrb[86].mxu1 }
 0x2c4   : > { %v2227_v11 = vmin.f32 %v2211_v47, 1.0  ;;  %v2212_v46 = vmax.f32 %v3930_v10, 0.0  ;;  %v2161_v49 = vpop.f32.mrb[87].mxu1 }
 0x2c5   : > { %v2225_v50 = vmin.f32 %v2209_v44, 1.0  ;;  %v2210_v51 = vmax.f32 %v2161_v49, 0.0 }
 0x2c6   : > { %3204 = vst [vmem:[%s4904_s15 + $0x2b0] sm:$0xff] %v2227_v11  ;;  %v2228_v52 = vmin.f32 %v2212_v46, 1.0 }
 0x2c7   : > { %3202 = vst [vmem:[%s4904_s15 + $0x2a0] sm:$0xff] %v2225_v50  ;;  %v2226_v14 = vmin.f32 %v2210_v51, 1.0 }
 0x2c8   : > { %3205 = vst [vmem:[%s4904_s15 + $0x2b8] sm:$0xff] %v2228_v52 }
 0x2c9   : > { %3203 = vst [vmem:[%s4904_s15 + $0x2a8] sm:$0xff] %v2226_v14  ;;  %v3933_v15 = vpop.f32.mrb[88].mxu1 }
 0x2ca   : > { %v2215_v53 = vmax.f32 %v3933_v15, 0.0  ;;  %v2174_v54 = vpop.f32.mrb[89].mxu1 }
 0x2cb   : > { %v2213_v55 = vmax.f32 %v2174_v54, 0.0  ;;  %v3934_v56 = vpop.f32.mrb[90].mxu1 }
 0x2cc   : > { %v2231_v18 = vmin.f32 %v2215_v53, 1.0  ;;  %v2216_v19 = vmax.f32 %v3934_v56, 0.0  ;;  %v2177_v57 = vpop.f32.mrb[91].mxu1 }
 0x2cd   : > { %v2229_v58 = vmin.f32 %v2213_v55, 1.0  ;;  %v2214_v59 = vmax.f32 %v2177_v57, 0.0 }
 0x2ce   : > { %3208 = vst [vmem:[%s4904_s15 + $0x2d0] sm:$0xff] %v2231_v18  ;;  %v2232_v60 = vmin.f32 %v2216_v19, 1.0 }
 0x2cf   : > { %3206 = vst [vmem:[%s4904_s15 + $0x2c0] sm:$0xff] %v2229_v58  ;;  %v2230_v22 = vmin.f32 %v2214_v59, 1.0 }
 0x2d0   : > { %3209 = vst [vmem:[%s4904_s15 + $0x2d8] sm:$0xff] %v2232_v60 }
 0x2d1   : > { %3207 = vst [vmem:[%s4904_s15 + $0x2c8] sm:$0xff] %v2230_v22  ;;  %v3937_v61 = vpop.f32.mrb[92].mxu1 }
 0x2d2   : > { %v2219_v62 = vmax.f32 %v3937_v61, 0.0  ;;  %v2190_v63 = vpop.f32.mrb[93].mxu1 }
 0x2d3   : > { %v2217_v0 = vmax.f32 %v2190_v63, 0.0  ;;  %v3938_v1 = vpop.f32.mrb[94].mxu1 }
 0x2d4   : > { %v2235_v2 = vmin.f32 %v2219_v62, 1.0  ;;  %v2220_v3 = vmax.f32 %v3938_v1, 0.0  ;;  %v2193_v5 = vpop.f32.mrb[95].mxu1 }
 0x2d5   : > { %v2233_v6 = vmin.f32 %v2217_v0, 1.0  ;;  %v2218_v32 = vmax.f32 %v2193_v5, 0.0 }
 0x2d6   : > { %3212 = vst [vmem:[%s4904_s15 + $0x2f0] sm:$0xff] %v2235_v2  ;;  %v2236_v7 = vmin.f32 %v2220_v3, 1.0 }
 0x2d7   : > { %3210 = vst [vmem:[%s4904_s15 + $0x2e0] sm:$0xff] %v2233_v6  ;;  %v2234_v8 = vmin.f32 %v2218_v32, 1.0 }
 0x2d8   : > { %3213 = vst [vmem:[%s4904_s15 + $0x2f8] sm:$0xff] %v2236_v7 }
 0x2d9   : > { %3211 = vst [vmem:[%s4904_s15 + $0x2e8] sm:$0xff] %v2234_v8  ;;  %v3989_v9 = vpop.f32.mrb[96].mxu1 }
 0x2da   : > { %v2523_v34 = vmax.f32 %v3989_v9, 0.0  ;;  %v2458_v12 = vpop.f32.mrb[97].mxu1 }
 0x2db   : > { %v2521_v36 = vmax.f32 %v2458_v12, 0.0  ;;  %v3990_v13 = vpop.f32.mrb[98].mxu1 }
 0x2dc   : > { %v2539_v16 = vmin.f32 %v2523_v34, 1.0  ;;  %v2524_v17 = vmax.f32 %v3990_v13, 0.0  ;;  %v2461_v20 = vpop.f32.mrb[99].mxu1 }
 0x2dd   : > { %v2537_v21 = vmin.f32 %v2521_v36, 1.0  ;;  %v2522_v38 = vmax.f32 %v2461_v20, 0.0 }
 0x2de   : > { %3240 = vst [vmem:[%s4904_s15 + $0x310] sm:$0xff] %v2539_v16  ;;  %v2540_v23 = vmin.f32 %v2524_v17, 1.0 }
 0x2df   : > { %3238 = vst [vmem:[%s4904_s15 + $0x300] sm:$0xff] %v2537_v21  ;;  %v2538_v40 = vmin.f32 %v2522_v38, 1.0 }
 0x2e0   : > { %3241 = vst [vmem:[%s4904_s15 + $0x318] sm:$0xff] %v2540_v23 }
 0x2e1   : > { %3239 = vst [vmem:[%s4904_s15 + $0x308] sm:$0xff] %v2538_v40  ;;  %v3993_v24 = vpop.f32.mrb[100].mxu1 }
 0x2e2   : > { %v2527_v25 = vmax.f32 %v3993_v24, 0.0  ;;  %v2474_v26 = vpop.f32.mrb[101].mxu1 }
 0x2e3   : > { %v2525_v27 = vmax.f32 %v2474_v26, 0.0  ;;  %v3994_v28 = vpop.f32.mrb[102].mxu1 }
 0x2e4   : > { %v2543_v29 = vmin.f32 %v2527_v25, 1.0  ;;  %v2528_v30 = vmax.f32 %v3994_v28, 0.0  ;;  %v2477_v31 = vpop.f32.mrb[103].mxu1 }
 0x2e5   : > { %v2541_v42 = vmin.f32 %v2525_v27, 1.0  ;;  %v2526_v33 = vmax.f32 %v2477_v31, 0.0 }
 0x2e6   : > { %3244 = vst [vmem:[%s4904_s15 + $0x330] sm:$0xff] %v2543_v29  ;;  %v2544_v35 = vmin.f32 %v2528_v30, 1.0 }
 0x2e7   : > { %3242 = vst [vmem:[%s4904_s15 + $0x320] sm:$0xff] %v2541_v42  ;;  %v2542_v37 = vmin.f32 %v2526_v33, 1.0 }
 0x2e8   : > { %3245 = vst [vmem:[%s4904_s15 + $0x338] sm:$0xff] %v2544_v35 }
 0x2e9   : > { %3243 = vst [vmem:[%s4904_s15 + $0x328] sm:$0xff] %v2542_v37  ;;  %v3997_v39 = vpop.f32.mrb[104].mxu1 }
 0x2ea   : > { %v2531_v41 = vmax.f32 %v3997_v39, 0.0  ;;  %v2490_v4 = vpop.f32.mrb[105].mxu1 }
 0x2eb   : > { %v2529_v43 = vmax.f32 %v2490_v4, 0.0  ;;  %v3998_v45 = vpop.f32.mrb[106].mxu1 }
 0x2ec   : > { %v2547_v47 = vmin.f32 %v2531_v41, 1.0  ;;  %v2532_v48 = vmax.f32 %v3998_v45, 0.0  ;;  %v2493_v44 = vpop.f32.mrb[107].mxu1 }
 0x2ed   : > { %v2545_v10 = vmin.f32 %v2529_v43, 1.0  ;;  %v2530_v11 = vmax.f32 %v2493_v44, 0.0 }
 0x2ee   : > { %3248 = vst [vmem:[%s4904_s15 + $0x350] sm:$0xff] %v2547_v47  ;;  %v2548_v46 = vmin.f32 %v2532_v48, 1.0 }
 0x2ef   : > { %3246 = vst [vmem:[%s4904_s15 + $0x340] sm:$0xff] %v2545_v10  ;;  %v2546_v49 = vmin.f32 %v2530_v11, 1.0 }
 0x2f0   : > { %3249 = vst [vmem:[%s4904_s15 + $0x358] sm:$0xff] %v2548_v46 }
 0x2f1   : > { %3247 = vst [vmem:[%s4904_s15 + $0x348] sm:$0xff] %v2546_v49  ;;  %v4001_v50 = vpop.f32.mrb[108].mxu1 }
 0x2f2   : > { %v2535_v51 = vmax.f32 %v4001_v50, 0.0  ;;  %v2506_v52 = vpop.f32.mrb[109].mxu1 }
 0x2f3   : > { %v2533_v14 = vmax.f32 %v2506_v52, 0.0  ;;  %v4002_v15 = vpop.f32.mrb[110].mxu1 }
 0x2f4   : > { %v2551_v53 = vmin.f32 %v2535_v51, 1.0  ;;  %v2536_v54 = vmax.f32 %v4002_v15, 0.0  ;;  %v2509_v55 = vpop.f32.mrb[111].mxu1 }
 0x2f5   : > { %v2549_v56 = vmin.f32 %v2533_v14, 1.0  ;;  %v2534_v18 = vmax.f32 %v2509_v55, 0.0 }
 0x2f6   : > { %3252 = vst [vmem:[%s4904_s15 + $0x370] sm:$0xff] %v2551_v53  ;;  %v2552_v19 = vmin.f32 %v2536_v54, 1.0 }
 0x2f7   : > { %3250 = vst [vmem:[%s4904_s15 + $0x360] sm:$0xff] %v2549_v56  ;;  %v2550_v57 = vmin.f32 %v2534_v18, 1.0 }
 0x2f8   : > { %3253 = vst [vmem:[%s4904_s15 + $0x378] sm:$0xff] %v2552_v19 }
 0x2f9   : > { %3251 = vst [vmem:[%s4904_s15 + $0x368] sm:$0xff] %v2550_v57  ;;  %v4053_v58 = vpop.f32.mrb[112].mxu1 }
 0x2fa   : > { %v2839_v59 = vmax.f32 %v4053_v58, 0.0  ;;  %v2774_v60 = vpop.f32.mrb[113].mxu1 }
 0x2fb   : > { %v2837_v22 = vmax.f32 %v2774_v60, 0.0  ;;  %v4054_v61 = vpop.f32.mrb[114].mxu1 }
 0x2fc   : > { %v2855_v62 = vmin.f32 %v2839_v59, 1.0  ;;  %v2840_v63 = vmax.f32 %v4054_v61, 0.0  ;;  %v2777_v0 = vpop.f32.mrb[115].mxu1 }
 0x2fd   : > { %v2853_v1 = vmin.f32 %v2837_v22, 1.0  ;;  %v2838_v2 = vmax.f32 %v2777_v0, 0.0 }
 0x2fe   : > { %3280 = vst [vmem:[%s4904_s15 + $0x390] sm:$0xff] %v2855_v62  ;;  %v2856_v3 = vmin.f32 %v2840_v63, 1.0 }
 0x2ff   : > { %3278 = vst [vmem:[%s4904_s15 + $0x380] sm:$0xff] %v2853_v1  ;;  %v2854_v5 = vmin.f32 %v2838_v2, 1.0 }
 0x300   : > { %3281 = vst [vmem:[%s4904_s15 + $0x398] sm:$0xff] %v2856_v3 }
 0x301   : > { %3279 = vst [vmem:[%s4904_s15 + $0x388] sm:$0xff] %v2854_v5  ;;  %v4057_v6 = vpop.f32.mrb[116].mxu1 }
 0x302   : > { %v2843_v32 = vmax.f32 %v4057_v6, 0.0  ;;  %v2790_v7 = vpop.f32.mrb[117].mxu1 }
 0x303   : > { %v2841_v8 = vmax.f32 %v2790_v7, 0.0  ;;  %v4058_v9 = vpop.f32.mrb[118].mxu1 }
 0x304   : > { %v2859_v34 = vmin.f32 %v2843_v32, 1.0  ;;  %v2844_v12 = vmax.f32 %v4058_v9, 0.0  ;;  %v2793_v36 = vpop.f32.mrb[119].mxu1 }
 0x305   : > { %v2857_v13 = vmin.f32 %v2841_v8, 1.0  ;;  %v2842_v16 = vmax.f32 %v2793_v36, 0.0 }
 0x306   : > { %3284 = vst [vmem:[%s4904_s15 + $0x3b0] sm:$0xff] %v2859_v34  ;;  %v2860_v17 = vmin.f32 %v2844_v12, 1.0 }
 0x307   : > { %3282 = vst [vmem:[%s4904_s15 + $0x3a0] sm:$0xff] %v2857_v13  ;;  %v2858_v20 = vmin.f32 %v2842_v16, 1.0 }
 0x308   : > { %3285 = vst [vmem:[%s4904_s15 + $0x3b8] sm:$0xff] %v2860_v17 }
 0x309   : > { %3283 = vst [vmem:[%s4904_s15 + $0x3a8] sm:$0xff] %v2858_v20  ;;  %v4061_v21 = vpop.f32.mrb[120].mxu1 }
 0x30a   : > { %v2847_v38 = vmax.f32 %v4061_v21, 0.0  ;;  %v2806_v23 = vpop.f32.mrb[121].mxu1 }
 0x30b   : > { %v2845_v40 = vmax.f32 %v2806_v23, 0.0  ;;  %v4062_v24 = vpop.f32.mrb[122].mxu1 }
 0x30c   : > { %v2863_v25 = vmin.f32 %v2847_v38, 1.0  ;;  %v2848_v26 = vmax.f32 %v4062_v24, 0.0  ;;  %v2809_v27 = vpop.f32.mrb[123].mxu1 }
 0x30d   : > { %v2861_v28 = vmin.f32 %v2845_v40, 1.0  ;;  %v2846_v29 = vmax.f32 %v2809_v27, 0.0 }
 0x30e   : > { %3288 = vst [vmem:[%s4904_s15 + $0x3d0] sm:$0xff] %v2863_v25  ;;  %v2864_v30 = vmin.f32 %v2848_v26, 1.0 }
 0x30f   : > { %3286 = vst [vmem:[%s4904_s15 + $0x3c0] sm:$0xff] %v2861_v28  ;;  %v2862_v31 = vmin.f32 %v2846_v29, 1.0 }
 0x310   : > { %3289 = vst [vmem:[%s4904_s15 + $0x3d8] sm:$0xff] %v2864_v30 }
 0x311   : > { %3287 = vst [vmem:[%s4904_s15 + $0x3c8] sm:$0xff] %v2862_v31  ;;  %v4065_v42 = vpop.f32.mrb[124].mxu1 }
 0x312   : > { %v2851_v33 = vmax.f32 %v4065_v42, 0.0  ;;  %v2822_v35 = vpop.f32.mrb[125].mxu1 }
 0x313   : > { %v2849_v37 = vmax.f32 %v2822_v35, 0.0  ;;  %v4066_v39 = vpop.f32.mrb[126].mxu1 }
 0x314   : > { %v2867_v41 = vmin.f32 %v2851_v33, 1.0  ;;  %v2852_v4 = vmax.f32 %v4066_v39, 0.0  ;;  %v2825_v43 = vpop.f32.mrb[127].mxu1 }
 0x315   : > { %v2865_v45 = vmin.f32 %v2849_v37, 1.0  ;;  %v2850_v47 = vmax.f32 %v2825_v43, 0.0 }
 0x316   : > { %3292 = vst [vmem:[%s4904_s15 + $0x3f0] sm:$0xff] %v2867_v41  ;;  %v2868_v48 = vmin.f32 %v2852_v4, 1.0 }
 0x317   : > { %3290 = vst [vmem:[%s4904_s15 + $0x3e0] sm:$0xff] %v2865_v45  ;;  %v2866_v44 = vmin.f32 %v2850_v47, 1.0 }
 0x318   : > { %3293 = vst [vmem:[%s4904_s15 + $0x3f8] sm:$0xff] %v2868_v48 }
 0x319   : > { %3291 = vst [vmem:[%s4904_s15 + $0x3e8] sm:$0xff] %v2866_v44 }
 0x31a PF: > { %p16_p11 = scmp.ge.s32.totalorder %s4340_s17, 6   ;;  %s5062_s12 = smov %s4284_s13 }
 0x31b   : > { %s5063_s13 = smov %s4288_s14  ;;  %s5064_s14 = smov %s4350_s20 }
 0x31c   : > { %s5065_s15 = smov %s4340_s17  ;;  %18 = sbr.rel (!%p16_p11) target bundleno = 5 (0x5), region = 99 }
 0x323   :  { %2907 = vsyncpa [#allocation3], 1 }
 0x324   :  { %2909 = vsyncpa [#allocation3 + $0x1], 1 }
 0x325   :  { %2910 = vsyncpa [#allocation5], 1 }
 0x326   :  { %2912 = vsyncpa [#allocation5 + $0x1], 1 }

</bundles_post_ra>
